<compile_context>
chip_gen: v6e
topology: v6e:2x2x1
jax: 0.10.0
libtpu: 0.0.40
codegen_flags: <defaults>
</compile_context>

<pallas_src>
import functools
import math

import jax
import jax.numpy as jnp
from jax import lax
from jax.experimental import pallas as pl
from jax.experimental.pallas import tpu as pltpu

LN_EPS = 1e-12            # BERT layer_norm_eps
MASK_BIAS = -10000.0


# --------------------------- compiler parameters ------------------------------

@functools.lru_cache(maxsize=None)
def _vmem_limit():
    """Per-generation scoped-VMEM limit: ~56 MiB on v7x (64 MiB physical),
    up to 100 MiB on v5e/v6e (128 MiB physical)."""
    cap = 64 * 1024 * 1024
    try:
        cap = int(pltpu.get_tpu_info().vmem_capacity_bytes)
    except Exception:
        pass
    return int(max(32 << 20, min(cap - (8 << 20), 100 << 20)))


def _mosaic_params(*semantics):
    return pltpu.CompilerParams(dimension_semantics=tuple(semantics),
                                vmem_limit_bytes=_vmem_limit())


# ------------------------------ shared math -----------------------------------

def _gelu(x):
    # TODO(synk): HF BERT uses exact erf-GELU; we use the tanh approximation
    # (Mosaic-safe transcendentals).  The pure-JAX reference matches it.
    c = math.sqrt(2.0 / math.pi)
    return 0.5 * x * (1.0 + jnp.tanh(c * (x + 0.044715 * x * x * x)))


def _ln(h, g, b, eps=LN_EPS):
    mu = jnp.mean(h, axis=-1, keepdims=True)
    var = jnp.mean(jnp.square(h - mu), axis=-1, keepdims=True)
    return (h - mu) * lax.rsqrt(var + eps) * g + b


def _dot(a, b):
    # bf16 MXU inputs, f32 accumulation.
    return jnp.dot(a.astype(jnp.bfloat16), b.astype(jnp.bfloat16),
                   preferred_element_type=jnp.float32)


def _dot_nt(a, b):
    # a @ b.T without materializing a transpose; bf16 in, f32 accum.
    return lax.dot_general(a.astype(jnp.bfloat16), b.astype(jnp.bfloat16),
                           (((1,), (1,)), ((), ())),
                           preferred_element_type=jnp.float32)


def _row_tiles(n, pref):
    """Row tiling with padding (never fall back to one giant block)."""
    if n <= pref:
        return n, n
    return pref, pl.cdiv(n, pref) * pref


# --------------------------- LayerNorm kernel ----------------------------------

def _ln_kernel(x_ref, g_ref, b_ref, o_ref, *, eps):
    o_ref[...] = _ln(x_ref[...].astype(jnp.float32),
                     g_ref[...].astype(jnp.float32),
                     b_ref[...].astype(jnp.float32), eps).astype(o_ref.dtype)


def layer_norm(x, gamma, beta, eps=LN_EPS):
    n, h = x.shape
    tm, n_pad = _row_tiles(n, 512)      # mem-bound: ~85% HBM roofline at 512
    xp = jnp.pad(x, ((0, n_pad - n), (0, 0))) if n_pad != n else x
    out = pl.pallas_call(
        functools.partial(_ln_kernel, eps=eps),
        grid=(n_pad // tm,),
        in_specs=[pl.BlockSpec((tm, h), lambda i: (i, 0)),
                  pl.BlockSpec((1, h), lambda i: (0, 0)),
                  pl.BlockSpec((1, h), lambda i: (0, 0))],
        out_specs=pl.BlockSpec((tm, h), lambda i: (i, 0)),
        out_shape=jax.ShapeDtypeStruct((n_pad, h), x.dtype),
        compiler_params=_mosaic_params("parallel"),
    )(xp, gamma.reshape(1, h), beta.reshape(1, h))
    return out[:n] if n_pad != n else out


# ---------------------- encoder: attention sub-block ---------------------------

def _attn_kernel(x_ref, m_ref, wqkv_ref, bqkv_ref, wo_ref, bo_ref,
                 g1_ref, be1_ref, o_ref, *, n_heads, head_dim, scale):
    x = x_ref[...].astype(jnp.float32)                                  # (S, H)
    s_len, hid = x.shape
    # additive attention-mask bias, built once (broadcast over heads & queries)
    bias = ((1.0 - m_ref[...].astype(jnp.float32)) * MASK_BIAS)[None]   # (1,1,S)

    # fused QKV: one (S,H)@(H,3H) MXU pass
    qkv = _dot(x, wqkv_ref[...]) + bqkv_ref[...].astype(jnp.float32)    # (S,3H)

    def heads(t):                                     # (S,H) -> (nH, S, dh)
        return t.reshape(s_len, n_heads, head_dim).transpose(1, 0, 2)

    q = heads(qkv[:, :hid]).astype(jnp.bfloat16)
    k = heads(qkv[:, hid:2 * hid]).astype(jnp.bfloat16)
    v = heads(qkv[:, 2 * hid:]).astype(jnp.bfloat16)

    # batched multi-head attention (leading head axis), f32 softmax
    # TODO(synk): for long sequences tile over heads / kv blocks (flash-style)
    # so the (nH, S, S) score tensor never fully materializes in VMEM.
    s = jnp.einsum("hqd,hkd->hqk", q, k,
                   preferred_element_type=jnp.float32) * scale + bias   # (nH,S,S)
    s = s - jnp.max(s, axis=-1, keepdims=True)
    p = jnp.exp(s)
    p = p * pl.reciprocal(jnp.sum(p, axis=-1, keepdims=True), approx=True)
    ctx = jnp.einsum("hqk,hkd->hqd", p.astype(jnp.bfloat16), v,
                     preferred_element_type=jnp.float32)                # (nH,S,dh)
    ctx = ctx.transpose(1, 0, 2).reshape(s_len, hid)                    # (S, H)

    attn = _dot(ctx, wo_ref[...]) + bo_ref[...].astype(jnp.float32)     # one dot
    o_ref[...] = _ln(attn + x, g1_ref[...].astype(jnp.float32),
                     be1_ref[...].astype(jnp.float32)).astype(o_ref.dtype)


def attention_block(x, mask3, lw, *, n_heads, head_dim):
    B, S, H = x.shape
    scale = 1.0 / math.sqrt(head_dim)
    # TODO(synk): pre-fuse / pre-cast these once at weight-load time in prod.
    wqkv = jnp.concatenate([lw["wq"], lw["wk"], lw["wv"]],
                           axis=1).astype(jnp.bfloat16)                 # (H,3H)
    bqkv = jnp.concatenate([lw["bq"], lw["bk"], lw["bv"]]).reshape(1, 3 * H)

    # TODO(synk): mark the constant-index weight specs pipeline_mode=
    # pl.Buffered(1) (single-buffered residency) once verified on the target
    # jax build; at bf16 BERT-base sizes the default double-buffering fits.
    def const(shape):
        return pl.BlockSpec(shape, lambda b: (0,) * len(shape))

    return pl.pallas_call(
        functools.partial(_attn_kernel, n_heads=n_heads,
                          head_dim=head_dim, scale=scale),
        grid=(B,),
        in_specs=[
            pl.BlockSpec((None, S, H), lambda b: (b, 0, 0)),   # x (batch squeezed)
            pl.BlockSpec((None, 1, S), lambda b: (b, 0, 0)),   # raw mask row
            const((H, 3 * H)), const((1, 3 * H)),              # wqkv, bqkv
            const((H, H)), const((1, H)),                      # wo, bo
            const((1, H)), const((1, H)),                      # ln1 gamma, beta
        ],
        out_specs=pl.BlockSpec((None, S, H), lambda b: (b, 0, 0)),
        out_shape=jax.ShapeDtypeStruct((B, S, H), x.dtype),
        compiler_params=_mosaic_params("parallel"),
    )(x, mask3, wqkv, bqkv,
      lw["wo"].astype(jnp.bfloat16), lw["bo"].reshape(1, H),
      lw["ln1_g"].reshape(1, H), lw["ln1_b"].reshape(1, H))


# ------------------------- encoder: FFN sub-block ------------------------------

def _ffn_kernel(h_ref, w1_ref, b1_ref, w2_ref, b2_ref, g2_ref, be2_ref, o_ref):
    h1 = h_ref[...].astype(jnp.float32)
    ff = _gelu(_dot(h1, w1_ref[...]) + b1_ref[...].astype(jnp.float32))
    ff = _dot(ff, w2_ref[...]) + b2_ref[...].astype(jnp.float32)
    o_ref[...] = _ln(ff + h1, g2_ref[...].astype(jnp.float32),
                     be2_ref[...].astype(jnp.float32)).astype(o_ref.dtype)


def ffn_block(h1_flat, lw):
    n, H = h1_flat.shape
    I = lw["w1"].shape[1]
    # 256-row tiles: multiple of the 256-wide v6e/v7x MXU (and of 128 on v5e);
    # row grid is "parallel" so both v7x TensorCores get work.
    tm, n_pad = _row_tiles(n, 256)
    hp = jnp.pad(h1_flat, ((0, n_pad - n), (0, 0))) if n_pad != n else h1_flat

    def const(shape):
        return pl.BlockSpec(shape, lambda i: (0,) * len(shape))

    # TODO(synk): for intermediate dims much larger than BERT-base, add a K
    # grid axis over I with a f32 VMEM accumulator (pl.when init/finalize).
    out = pl.pallas_call(
        _ffn_kernel,
        grid=(n_pad // tm,),
        in_specs=[pl.BlockSpec((tm, H), lambda i: (i, 0)),
                  const((H, I)), const((1, I)),
                  const((I, H)), const((1, H)),
                  const((1, H)), const((1, H))],
        out_specs=pl.BlockSpec((tm, H), lambda i: (i, 0)),
        out_shape=jax.ShapeDtypeStruct((n_pad, H), h1_flat.dtype),
        compiler_params=_mosaic_params("parallel"),
    )(hp, lw["w1"].astype(jnp.bfloat16), lw["b1"].reshape(1, I),
      lw["w2"].astype(jnp.bfloat16), lw["b2"].reshape(1, H),
      lw["ln2_g"].reshape(1, H), lw["ln2_b"].reshape(1, H))
    return out[:n] if n_pad != n else out


def bert_layer(x, mask3, lw, *, n_heads, head_dim):
    B, S, H = x.shape
    h1 = attention_block(x, mask3, lw, n_heads=n_heads, head_dim=head_dim)
    h2 = ffn_block(h1.reshape(B * S, H), lw)
    return h2.reshape(B, S, H)


# --------------------------------- MLM head ------------------------------------

def _mlm_transform_kernel(x_ref, wt_ref, bt_ref, g_ref, be_ref, o_ref):
    x = x_ref[...].astype(jnp.float32)
    h = _gelu(_dot(x, wt_ref[...]) + bt_ref[...].astype(jnp.float32))
    o_ref[...] = _ln(h, g_ref[...].astype(jnp.float32),
                     be_ref[...].astype(jnp.float32)).astype(o_ref.dtype)


def _mlm_decoder_kernel(h_ref, emb_ref, bias_ref, o_ref):
    # tied decoder: scores = h @ word_emb^T + b, one vocab tile per grid step
    o_ref[...] = (_dot_nt(h_ref[...], emb_ref[...])
                  + bias_ref[...].astype(jnp.float32)).astype(o_ref.dtype)


def mlm_head(bert_feat, masked_pos, word_emb, head):
    B, S, H = bert_feat.shape
    M = masked_pos.shape[1]
    V = word_emb.shape[0]
    n_rows = B * M

    # ---- stage 0: gather the masked rows (XLA glue, one small gather) --------
    gathered = jnp.take_along_axis(bert_feat, masked_pos[..., None], axis=1)
    gathered = gathered.reshape(n_rows, H)

    # ---- stage 1: single batched (B*M,H)@(H,H) + GELU + LN --------------------
    tm, n_pad = _row_tiles(n_rows, 256)
    gp = jnp.pad(gathered, ((0, n_pad - n_rows), (0, 0))) if n_pad != n_rows \
        else gathered

    def const(shape):
        return pl.BlockSpec(shape, lambda i: (0,) * len(shape))

    hidden = pl.pallas_call(
        _mlm_transform_kernel,
        grid=(n_pad // tm,),
        in_specs=[pl.BlockSpec((tm, H), lambda i: (i, 0)),
                  const((H, H)), const((1, H)),
                  const((1, H)), const((1, H))],
        out_specs=pl.BlockSpec((tm, H), lambda i: (i, 0)),
        out_shape=jax.ShapeDtypeStruct((n_pad, H), jnp.float32),
        compiler_params=_mosaic_params("parallel"),
    )(gp, head["transform_w"].astype(jnp.bfloat16),
      head["transform_b"].reshape(1, H),
      head["ln_g"].reshape(1, H), head["ln_b"].reshape(1, H))
    hidden = hidden[:n_rows] if n_pad != n_rows else hidden

    # ---- stage 2: tied decoder, 512-wide vocab tiles, bf16 streamed weights ---
    TV = 512
    V_pad = pl.cdiv(V, TV) * TV
    emb = word_emb.astype(jnp.bfloat16)           # halve HBM bytes (mem-bound)
    dec_b = head["decoder_b"]
    if V_pad != V:
        emb = jnp.pad(emb, ((0, V_pad - V), (0, 0)))
        dec_b = jnp.pad(dec_b, (0, V_pad - V))

    scores = pl.pallas_call(
        _mlm_decoder_kernel,
        grid=(V_pad // TV,),
        in_specs=[pl.BlockSpec((n_rows, H), lambda j: (0, 0)),
                  pl.BlockSpec((TV, H), lambda j: (j, 0)),   # word_emb kept [V,H]
                  pl.BlockSpec((1, TV), lambda j: (0, j))],
        out_specs=pl.BlockSpec((n_rows, TV), lambda j: (0, j)),
        out_shape=jax.ShapeDtypeStruct((n_rows, V_pad), jnp.float32),
        compiler_params=_mosaic_params("parallel"),
    )(hidden, emb, dec_b.reshape(1, V_pad))
    scores = scores[:, :V] if V_pad != V else scores
    return scores.reshape(B, M, V)


# ------------------------------ BERT encoder -----------------------------------

def bert_encoder(ids, mask, params, cfg):
    B, S = ids.shape
    H = cfg["hidden"]
    # embedding lookups stay in XLA glue; everything downstream is Pallas
    emb = (jnp.take(params["word_emb"], ids, axis=0)
           + params["pos_emb"][:S][None, :, :]
           + params["type_emb"][0][None, None, :])
    x = layer_norm(emb.reshape(B * S, H),
                   params["emb_ln_g"], params["emb_ln_b"]).reshape(B, S, H)
    mask3 = mask.astype(jnp.float32).reshape(B, 1, S)
    for lw in params["layers"]:
        x = bert_layer(x, mask3, lw, n_heads=cfg["heads"],
                       head_dim=cfg["head_dim"])
    return x


def nlp_bert_model_forward(params, cfg, ids, mask, masked_pos):
    bert_feat = bert_encoder(ids, mask, params, cfg)      # last_hidden_state
    # TODO(synk): BertPreTrainingHeads also returns a seq_relationship score
    # which NLPBertModel.forward discards; only prediction_scores is computed.
    return mlm_head(bert_feat, masked_pos, params["word_emb"], params["head"])


# -------------------------------- parameters ------------------------------------

def init_params(key, cfg):
    V, H = cfg["vocab"], cfg["hidden"]
    inter, L, P = cfg["intermediate"], cfg["layers"], cfg["max_pos"]
    keys = iter(jax.random.split(key, 16 * L + 32))

    def w(shape, scale=0.02):
        return scale * jax.random.normal(next(keys), shape, jnp.float32)

    def gamma(shape):
        return 1.0 + 0.05 * jax.random.normal(next(keys), shape, jnp.float32)

    params = {
        "word_emb": w((V, H)),
        "pos_emb": w((P, H)),
        "type_emb": w((2, H)),
        "emb_ln_g": gamma((H,)), "emb_ln_b": w((H,)),
        "layers": [],
    }
    for _ in range(L):
        params["layers"].append({
            "wq": w((H, H)), "bq": w((H,)),
            "wk": w((H, H)), "bk": w((H,)),
            "wv": w((H, H)), "bv": w((H,)),
            "wo": w((H, H)), "bo": w((H,)),
            "ln1_g": gamma((H,)), "ln1_b": w((H,)),
            "w1": w((H, inter)), "b1": w((inter,)),
            "w2": w((inter, H)), "b2": w((H,)),
            "ln2_g": gamma((H,)), "ln2_b": w((H,)),
        })
    # tied decoder: uses params["word_emb"] directly (no transposed copy in HBM)
    params["head"] = {
        "transform_w": w((H, H)), "transform_b": w((H,)),
        "ln_g": gamma((H,)), "ln_b": w((H,)),
        "decoder_b": w((V,)),
    }
    return params


# ----------------------------- pure-JAX reference -------------------------------

def reference_forward(params, cfg, ids, mask, masked_pos):
    B, S = ids.shape
    H, nH, dh = cfg["hidden"], cfg["heads"], cfg["head_dim"]

    emb = (jnp.take(params["word_emb"], ids, axis=0)
           + params["pos_emb"][:S][None] + params["type_emb"][0][None, None])
    x = _ln(emb, params["emb_ln_g"], params["emb_ln_b"])
    ext = (1.0 - mask.astype(jnp.float32)) * MASK_BIAS
    scale = 1.0 / math.sqrt(dh)
    for lw in params["layers"]:
        q = x @ lw["wq"] + lw["bq"]
        k = x @ lw["wk"] + lw["bk"]
        v = x @ lw["wv"] + lw["bv"]
        sh = lambda t: t.reshape(B, S, nH, dh).transpose(0, 2, 1, 3)
        s = jnp.einsum("bhqd,bhkd->bhqk", sh(q), sh(k)) * scale + ext[:, None, None, :]
        p = jax.nn.softmax(s, axis=-1)
        ctx = jnp.einsum("bhqk,bhkd->bhqd", p, sh(v)).transpose(0, 2, 1, 3).reshape(B, S, H)
        attn = _ln(ctx @ lw["wo"] + lw["bo"] + x, lw["ln1_g"], lw["ln1_b"])
        ffn = _gelu(attn @ lw["w1"] + lw["b1"]) @ lw["w2"] + lw["b2"]
        x = _ln(ffn + attn, lw["ln2_g"], lw["ln2_b"])
    gathered = jnp.take_along_axis(x, masked_pos[..., None], axis=1)   # (B, M, H)
    hd = params["head"]
    h = _ln(_gelu(gathered @ hd["transform_w"] + hd["transform_b"]),
            hd["ln_g"], hd["ln_b"])
    return h @ params["word_emb"].T + hd["decoder_b"]


# ------------------------------------ main ---------------------------------------

if __name__ == "__main__":
    cfg = dict(vocab=512, hidden=128, heads=4, head_dim=32,
               intermediate=256, layers=2, max_pos=32)
    B, S, M = 2, 16, 4

    key = jax.random.PRNGKey(0)
    kp, ki, km = jax.random.split(key, 3)
    params = init_params(kp, cfg)

    ids = jax.random.randint(ki, (B, S), 0, cfg["vocab"], dtype=jnp.int32)
    mask = jnp.ones((B, S), jnp.float32).at[1, 10:].set(0.0)
    masked_pos = jax.random.randint(km, (B, M), 0, S, dtype=jnp.int32)

    run = jax.jit(lambda p, i, m, mp: nlp_bert_model_forward(p, cfg, i, m, mp))
    out = jax.block_until_ready(run(params, ids, mask, masked_pos))

    ref = reference_forward(params, cfg, ids, mask, masked_pos)
    assert out.shape == (B, M, cfg["vocab"]), out.shape
    max_err = float(jnp.max(jnp.abs(out - ref)))
    # 2e-2 tolerance: bf16 matmul inputs (f32 accum) + approx-reciprocal softmax
    # vs. the all-f32 JAX reference; everything else is bit-comparable f32.
    assert max_err < 2e-2, f"mismatch vs JAX reference: {max_err}"
    print("KERNEL_OK")
</pallas_src>

<mosaic_0001>
module attributes {stable_mosaic.version = 11 : i64} {
  func.func @_ln_kernel(%arg0: i32, %arg1: memref<32x128xf32, #tpu.memory_space<vmem>>, %arg2: memref<1x128xf32, #tpu.memory_space<vmem>>, %arg3: memref<1x128xf32, #tpu.memory_space<vmem>>, %arg4: memref<32x128xf32, #tpu.memory_space<vmem>>) attributes {dimension_semantics = [#tpu.dimension_semantics<parallel>], iteration_bounds = array<i64: 1>, scalar_prefetch = 0 : i64, scratch_operands = 0 : i64, tpu.core_type = #tpu.core_type<tc>, window_params = [{transform_indices = @transform_0, window_bounds = array<i64: 32, 128>}, {pipeline_mode = #tpu.pipeline_mode<synchronous>, transform_indices = @transform_1, window_bounds = array<i64: 1, 128>}, {pipeline_mode = #tpu.pipeline_mode<synchronous>, transform_indices = @transform_2, window_bounds = array<i64: 1, 128>}, {transform_indices = @transform_3, window_bounds = array<i64: 32, 128>}]} {
    %c0 = arith.constant 0 : index
    %c0_0 = arith.constant 0 : index
    %0 = vector.load %arg1[%c0, %c0_0] : memref<32x128xf32, #tpu.memory_space<vmem>>, vector<32x128xf32>
    %c0_1 = arith.constant 0 : index
    %c0_2 = arith.constant 0 : index
    %1 = vector.load %arg2[%c0_1, %c0_2] : memref<1x128xf32, #tpu.memory_space<vmem>>, vector<1x128xf32>
    %c0_3 = arith.constant 0 : index
    %c0_4 = arith.constant 0 : index
    %2 = vector.load %arg3[%c0_3, %c0_4] : memref<1x128xf32, #tpu.memory_space<vmem>>, vector<1x128xf32>
    %cst = arith.constant dense<0.000000e+00> : vector<32xf32>
    %3 = vector.multi_reduction <add>, %0, %cst [1] : vector<32x128xf32> to vector<32xf32>
    %4 = vector.shape_cast %3 : vector<32xf32> to vector<32x1xf32>
    %cst_5 = arith.constant 1.280000e+02 : f32
    %5 = vector.broadcast %cst_5 : f32 to vector<32x1xf32>
    %6 = arith.divf %4, %5 : vector<32x1xf32>
    %7 = vector.broadcast %6 : vector<32x1xf32> to vector<32x128xf32>
    %8 = arith.subf %0, %7 : vector<32x128xf32>
    %9 = arith.mulf %8, %8 : vector<32x128xf32>
    %cst_6 = arith.constant dense<0.000000e+00> : vector<32xf32>
    %10 = vector.multi_reduction <add>, %9, %cst_6 [1] : vector<32x128xf32> to vector<32xf32>
    %11 = vector.shape_cast %10 : vector<32xf32> to vector<32x1xf32>
    %cst_7 = arith.constant 1.280000e+02 : f32
    %12 = vector.broadcast %cst_7 : f32 to vector<32x1xf32>
    %13 = arith.divf %11, %12 : vector<32x1xf32>
    %14 = vector.broadcast %6 : vector<32x1xf32> to vector<32x128xf32>
    %15 = arith.subf %0, %14 : vector<32x128xf32>
    %cst_8 = arith.constant 9.99999996E-13 : f32
    %16 = vector.broadcast %cst_8 : f32 to vector<32x1xf32>
    %17 = arith.addf %13, %16 : vector<32x1xf32>
    %18 = math.rsqrt %17 : vector<32x1xf32>
    %19 = vector.broadcast %18 : vector<32x1xf32> to vector<32x128xf32>
    %20 = arith.mulf %15, %19 : vector<32x128xf32>
    %21 = vector.broadcast %1 : vector<1x128xf32> to vector<32x128xf32>
    %22 = arith.mulf %20, %21 : vector<32x128xf32>
    %23 = vector.broadcast %2 : vector<1x128xf32> to vector<32x128xf32>
    %24 = arith.addf %22, %23 : vector<32x128xf32>
    %c0_9 = arith.constant 0 : index
    %c0_10 = arith.constant 0 : index
    %25 = vector.load %arg4[%c0_9, %c0_10] : memref<32x128xf32, #tpu.memory_space<vmem>>, vector<32x128xf32>
    tpu.vector_store %arg4[%c0_9, %c0_10], %24 {strides = array<i32>} : memref<32x128xf32, #tpu.memory_space<vmem>>, vector<32x128xf32>,
    return
  }
  func.func @transform_0(%arg0: i32) -> (i32, i32) {
    %c0_i32 = arith.constant 0 : i32
    %c0_i32_0 = arith.constant 0 : i32
    return %arg0, %c0_i32 : i32, i32
  }
  func.func @transform_1(%arg0: i32) -> (i32, i32) {
    %c0_i32 = arith.constant 0 : i32
    %c0_i32_0 = arith.constant 0 : i32
    %c0_i32_1 = arith.constant 0 : i32
    return %c0_i32, %c0_i32_0 : i32, i32
  }
  func.func @transform_2(%arg0: i32) -> (i32, i32) {
    %c0_i32 = arith.constant 0 : i32
    %c0_i32_0 = arith.constant 0 : i32
    %c0_i32_1 = arith.constant 0 : i32
    return %c0_i32, %c0_i32_0 : i32, i32
  }
  func.func @transform_3(%arg0: i32) -> (i32, i32) {
    %c0_i32 = arith.constant 0 : i32
    %c0_i32_0 = arith.constant 0 : i32
    return %arg0, %c0_i32 : i32, i32
  }
}

module attributes {stable_mosaic.version = 11 : i64} {
  func.func @_attn_kernel(%arg0: i32, %arg1: memref<1x16x128xf32, #tpu.memory_space<vmem>>, %arg2: memref<1x1x16xf32, #tpu.memory_space<vmem>>, %arg3: memref<128x384xbf16, #tpu.memory_space<vmem>>, %arg4: memref<1x384xf32, #tpu.memory_space<vmem>>, %arg5: memref<128x128xbf16, #tpu.memory_space<vmem>>, %arg6: memref<1x128xf32, #tpu.memory_space<vmem>>, %arg7: memref<1x128xf32, #tpu.memory_space<vmem>>, %arg8: memref<1x128xf32, #tpu.memory_space<vmem>>, %arg9: memref<1x16x128xf32, #tpu.memory_space<vmem>>) attributes {dimension_semantics = [#tpu.dimension_semantics<parallel>], iteration_bounds = array<i64: 2>, scalar_prefetch = 0 : i64, scratch_operands = 0 : i64, tpu.core_type = #tpu.core_type<tc>, window_params = [{transform_indices = @transform_0, window_bounds = array<i64: 1, 16, 128>}, {transform_indices = @transform_1, window_bounds = array<i64: 1, 1, 16>}, {pipeline_mode = #tpu.pipeline_mode<synchronous>, transform_indices = @transform_2, window_bounds = array<i64: 128, 384>}, {pipeline_mode = #tpu.pipeline_mode<synchronous>, transform_indices = @transform_3, window_bounds = array<i64: 1, 384>}, {pipeline_mode = #tpu.pipeline_mode<synchronous>, transform_indices = @transform_4, window_bounds = array<i64: 128, 128>}, {pipeline_mode = #tpu.pipeline_mode<synchronous>, transform_indices = @transform_5, window_bounds = array<i64: 1, 128>}, {pipeline_mode = #tpu.pipeline_mode<synchronous>, transform_indices = @transform_6, window_bounds = array<i64: 1, 128>}, {pipeline_mode = #tpu.pipeline_mode<synchronous>, transform_indices = @transform_7, window_bounds = array<i64: 1, 128>}, {transform_indices = @transform_8, window_bounds = array<i64: 1, 16, 128>}]} {
    %c0 = arith.constant 0 : index
    %c0_0 = arith.constant 0 : index
    %c0_1 = arith.constant 0 : index
    %0 = vector.load %arg1[%c0, %c0_0, %c0_1] : memref<1x16x128xf32, #tpu.memory_space<vmem>>, vector<1x16x128xf32>
    %1 = vector.shape_cast %0 : vector<1x16x128xf32> to vector<16x128xf32>
    %c0_2 = arith.constant 0 : index
    %c0_3 = arith.constant 0 : index
    %c0_4 = arith.constant 0 : index
    %2 = vector.load %arg2[%c0_2, %c0_3, %c0_4] : memref<1x1x16xf32, #tpu.memory_space<vmem>>, vector<1x1x16xf32>
    %3 = vector.shape_cast %2 : vector<1x1x16xf32> to vector<1x16xf32>
    %cst = arith.constant 1.000000e+00 : f32
    %4 = vector.broadcast %cst : f32 to vector<1x16xf32>
    %5 = arith.subf %4, %3 : vector<1x16xf32>
    %cst_5 = arith.constant -1.000000e+04 : f32
    %6 = vector.broadcast %cst_5 : f32 to vector<1x16xf32>
    %7 = arith.mulf %5, %6 : vector<1x16xf32>
    %8 = vector.shape_cast %7 : vector<1x16xf32> to vector<1x1x16xf32>
    %c0_6 = arith.constant 0 : index
    %c0_7 = arith.constant 0 : index
    %9 = vector.load %arg3[%c0_6, %c0_7] : memref<128x384xbf16, #tpu.memory_space<vmem>>, vector<128x384xbf16>
    %10 = arith.truncf %1 : vector<16x128xf32> to vector<16x128xbf16>
    %cst_8 = arith.constant dense<0.000000e+00> : vector<16x384xf32>
    %11 = tpu.matmul %10, %9, %cst_8 {dimension_numbers = #tpu.dot_dimension_numbers<[1], [0], [0], [1], [0, 0, 1, 1], [], []>} : vector<16x128xbf16>, vector<128x384xbf16>, vector<16x384xf32> -> vector<16x384xf32>
    %c0_9 = arith.constant 0 : index
    %c0_10 = arith.constant 0 : index
    %12 = vector.load %arg4[%c0_9, %c0_10] : memref<1x384xf32, #tpu.memory_space<vmem>>, vector<1x384xf32>
    %13 = vector.broadcast %12 : vector<1x384xf32> to vector<16x384xf32>
    %14 = arith.addf %11, %13 : vector<16x384xf32>
    %15 = vector.extract_strided_slice %14 {offsets = [0, 0], sizes = [16, 128], strides = [1, 1]} : vector<16x384xf32> to vector<16x128xf32>
    %16 = vector.shape_cast %15 : vector<16x128xf32> to vector<16x4x32xf32>
    %17 = tpu.transpose %16, [1, 0, 2] : vector<16x4x32xf32> -> vector<4x16x32xf32>
    %18 = arith.truncf %17 : vector<4x16x32xf32> to vector<4x16x32xbf16>
    %19 = vector.extract_strided_slice %14 {offsets = [0, 128], sizes = [16, 128], strides = [1, 1]} : vector<16x384xf32> to vector<16x128xf32>
    %20 = vector.shape_cast %19 : vector<16x128xf32> to vector<16x4x32xf32>
    %21 = tpu.transpose %20, [1, 0, 2] : vector<16x4x32xf32> -> vector<4x16x32xf32>
    %22 = arith.truncf %21 : vector<4x16x32xf32> to vector<4x16x32xbf16>
    %23 = vector.extract_strided_slice %14 {offsets = [0, 256], sizes = [16, 128], strides = [1, 1]} : vector<16x384xf32> to vector<16x128xf32>
    %24 = vector.shape_cast %23 : vector<16x128xf32> to vector<16x4x32xf32>
    %25 = tpu.transpose %24, [1, 0, 2] : vector<16x4x32xf32> -> vector<4x16x32xf32>
    %26 = arith.truncf %25 : vector<4x16x32xf32> to vector<4x16x32xbf16>
    "tpu.trace_start"() <{level = 10 : i32, message = "hqd,hkd->hqk"}> : () -> ()
    %cst_11 = arith.constant dense<0.000000e+00> : vector<4x16x16xf32>
    %27 = tpu.matmul %18, %22, %cst_11 {dimension_numbers = #tpu.dot_dimension_numbers<[2], [2], [1], [1], [0, 0, 0, 1, 1, 1], [0], [0]>} : vector<4x16x32xbf16>, vector<4x16x32xbf16>, vector<4x16x16xf32> -> vector<4x16x16xf32>
    "tpu.trace_stop"() : () -> ()
    %cst_12 = arith.constant 0.176776692 : f32
    %28 = vector.broadcast %cst_12 : f32 to vector<4x16x16xf32>
    %29 = arith.mulf %27, %28 : vector<4x16x16xf32>
    %30 = vector.broadcast %8 : vector<1x1x16xf32> to vector<4x16x16xf32>
    %31 = arith.addf %29, %30 : vector<4x16x16xf32>
    %cst_13 = arith.constant dense<0xFF800000> : vector<4x16xf32>
    %32 = vector.multi_reduction <maximumf>, %31, %cst_13 [2] : vector<4x16x16xf32> to vector<4x16xf32>
    %33 = vector.shape_cast %32 : vector<4x16xf32> to vector<4x16x1xf32>
    %34 = vector.broadcast %33 : vector<4x16x1xf32> to vector<4x16x16xf32>
    %35 = arith.subf %31, %34 : vector<4x16x16xf32>
    %36 = math.exp %35 : vector<4x16x16xf32>
    %cst_14 = arith.constant dense<0.000000e+00> : vector<4x16xf32>
    %37 = vector.multi_reduction <add>, %36, %cst_14 [2] : vector<4x16x16xf32> to vector<4x16xf32>
    %38 = vector.shape_cast %37 : vector<4x16xf32> to vector<4x16x1xf32>
    %39 = tpu.reciprocal %38 {approx = true} : vector<4x16x1xf32> -> vector<4x16x1xf32>
    %40 = vector.broadcast %39 : vector<4x16x1xf32> to vector<4x16x16xf32>
    %41 = arith.mulf %36, %40 : vector<4x16x16xf32>
    %42 = arith.truncf %41 : vector<4x16x16xf32> to vector<4x16x16xbf16>
    "tpu.trace_start"() <{level = 10 : i32, message = "hqk,hkd->hqd"}> : () -> ()
    %cst_15 = arith.constant dense<0.000000e+00> : vector<4x16x32xf32>
    %43 = tpu.matmul %42, %26, %cst_15 {dimension_numbers = #tpu.dot_dimension_numbers<[2], [1], [1], [2], [0, 0, 0, 1, 1, 2], [0], [0]>} : vector<4x16x16xbf16>, vector<4x16x32xbf16>, vector<4x16x32xf32> -> vector<4x16x32xf32>
    "tpu.trace_stop"() : () -> ()
    %44 = tpu.transpose %43, [1, 0, 2] : vector<4x16x32xf32> -> vector<16x4x32xf32>
    %45 = vector.shape_cast %44 : vector<16x4x32xf32> to vector<16x128xf32>
    %c0_16 = arith.constant 0 : index
    %c0_17 = arith.constant 0 : index
    %46 = vector.load %arg5[%c0_16, %c0_17] : memref<128x128xbf16, #tpu.memory_space<vmem>>, vector<128x128xbf16>
    %47 = arith.truncf %45 : vector<16x128xf32> to vector<16x128xbf16>
    %cst_18 = arith.constant dense<0.000000e+00> : vector<16x128xf32>
    %48 = tpu.matmul %47, %46, %cst_18 {dimension_numbers = #tpu.dot_dimension_numbers<[1], [0], [0], [1], [0, 0, 1, 1], [], []>} : vector<16x128xbf16>, vector<128x128xbf16>, vector<16x128xf32> -> vector<16x128xf32>
    %c0_19 = arith.constant 0 : index
    %c0_20 = arith.constant 0 : index
    %49 = vector.load %arg6[%c0_19, %c0_20] : memref<1x128xf32, #tpu.memory_space<vmem>>, vector<1x128xf32>
    %50 = vector.broadcast %49 : vector<1x128xf32> to vector<16x128xf32>
    %51 = arith.addf %48, %50 : vector<16x128xf32>
    %52 = arith.addf %51, %1 : vector<16x128xf32>
    %c0_21 = arith.constant 0 : index
    %c0_22 = arith.constant 0 : index
    %53 = vector.load %arg7[%c0_21, %c0_22] : memref<1x128xf32, #tpu.memory_space<vmem>>, vector<1x128xf32>
    %c0_23 = arith.constant 0 : index
    %c0_24 = arith.constant 0 : index
    %54 = vector.load %arg8[%c0_23, %c0_24] : memref<1x128xf32, #tpu.memory_space<vmem>>, vector<1x128xf32>
    %cst_25 = arith.constant dense<0.000000e+00> : vector<16xf32>
    %55 = vector.multi_reduction <add>, %52, %cst_25 [1] : vector<16x128xf32> to vector<16xf32>
    %56 = vector.shape_cast %55 : vector<16xf32> to vector<16x1xf32>
    %cst_26 = arith.constant 1.280000e+02 : f32
    %57 = vector.broadcast %cst_26 : f32 to vector<16x1xf32>
    %58 = arith.divf %56, %57 : vector<16x1xf32>
    %59 = vector.broadcast %58 : vector<16x1xf32> to vector<16x128xf32>
    %60 = arith.subf %52, %59 : vector<16x128xf32>
    %61 = arith.mulf %60, %60 : vector<16x128xf32>
    %cst_27 = arith.constant dense<0.000000e+00> : vector<16xf32>
    %62 = vector.multi_reduction <add>, %61, %cst_27 [1] : vector<16x128xf32> to vector<16xf32>
    %63 = vector.shape_cast %62 : vector<16xf32> to vector<16x1xf32>
    %cst_28 = arith.constant 1.280000e+02 : f32
    %64 = vector.broadcast %cst_28 : f32 to vector<16x1xf32>
    %65 = arith.divf %63, %64 : vector<16x1xf32>
    %66 = vector.broadcast %58 : vector<16x1xf32> to vector<16x128xf32>
    %67 = arith.subf %52, %66 : vector<16x128xf32>
    %cst_29 = arith.constant 9.99999996E-13 : f32
    %68 = vector.broadcast %cst_29 : f32 to vector<16x1xf32>
    %69 = arith.addf %65, %68 : vector<16x1xf32>
    %70 = math.rsqrt %69 : vector<16x1xf32>
    %71 = vector.broadcast %70 : vector<16x1xf32> to vector<16x128xf32>
    %72 = arith.mulf %67, %71 : vector<16x128xf32>
    %73 = vector.broadcast %53 : vector<1x128xf32> to vector<16x128xf32>
    %74 = arith.mulf %72, %73 : vector<16x128xf32>
    %75 = vector.broadcast %54 : vector<1x128xf32> to vector<16x128xf32>
    %76 = arith.addf %74, %75 : vector<16x128xf32>
    %c0_30 = arith.constant 0 : index
    %c0_31 = arith.constant 0 : index
    %c0_32 = arith.constant 0 : index
    %77 = vector.load %arg9[%c0_30, %c0_31, %c0_32] : memref<1x16x128xf32, #tpu.memory_space<vmem>>, vector<1x16x128xf32>
    %78 = vector.shape_cast %77 : vector<1x16x128xf32> to vector<16x128xf32>
    %79 = vector.shape_cast %76 : vector<16x128xf32> to vector<1x16x128xf32>
    tpu.vector_store %arg9[%c0_30, %c0_31, %c0_32], %79 {strides = array<i32>} : memref<1x16x128xf32, #tpu.memory_space<vmem>>, vector<1x16x128xf32>,
    return
  }
  func.func @transform_0(%arg0: i32) -> (i32, i32, i32) {
    %c0_i32 = arith.constant 0 : i32
    %c0_i32_0 = arith.constant 0 : i32
    %c0_i32_1 = arith.constant 0 : i32
    return %arg0, %c0_i32, %c0_i32_0 : i32, i32, i32
  }
  func.func @transform_1(%arg0: i32) -> (i32, i32, i32) {
    %c0_i32 = arith.constant 0 : i32
    %c0_i32_0 = arith.constant 0 : i32
    %c0_i32_1 = arith.constant 0 : i32
    return %arg0, %c0_i32, %c0_i32_0 : i32, i32, i32
  }
  func.func @transform_2(%arg0: i32) -> (i32, i32) {
    %c0_i32 = arith.constant 0 : i32
    %c0_i32_0 = arith.constant 0 : i32
    %c0_i32_1 = arith.constant 0 : i32
    return %c0_i32, %c0_i32_0 : i32, i32
  }
  func.func @transform_3(%arg0: i32) -> (i32, i32) {
    %c0_i32 = arith.constant 0 : i32
    %c0_i32_0 = arith.constant 0 : i32
    %c0_i32_1 = arith.constant 0 : i32
    return %c0_i32, %c0_i32_0 : i32, i32
  }
  func.func @transform_4(%arg0: i32) -> (i32, i32) {
    %c0_i32 = arith.constant 0 : i32
    %c0_i32_0 = arith.constant 0 : i32
    %c0_i32_1 = arith.constant 0 : i32
    return %c0_i32, %c0_i32_0 : i32, i32
  }
  func.func @transform_5(%arg0: i32) -> (i32, i32) {
    %c0_i32 = arith.constant 0 : i32
    %c0_i32_0 = arith.constant 0 : i32
    %c0_i32_1 = arith.constant 0 : i32
    return %c0_i32, %c0_i32_0 : i32, i32
  }
  func.func @transform_6(%arg0: i32) -> (i32, i32) {
    %c0_i32 = arith.constant 0 : i32
    %c0_i32_0 = arith.constant 0 : i32
    %c0_i32_1 = arith.constant 0 : i32
    return %c0_i32, %c0_i32_0 : i32, i32
  }
  func.func @transform_7(%arg0: i32) -> (i32, i32) {
    %c0_i32 = arith.constant 0 : i32
    %c0_i32_0 = arith.constant 0 : i32
    %c0_i32_1 = arith.constant 0 : i32
    return %c0_i32, %c0_i32_0 : i32, i32
  }
  func.func @transform_8(%arg0: i32) -> (i32, i32, i32) {
    %c0_i32 = arith.constant 0 : i32
    %c0_i32_0 = arith.constant 0 : i32
    %c0_i32_1 = arith.constant 0 : i32
    return %arg0, %c0_i32, %c0_i32_0 : i32, i32, i32
  }
}

module attributes {stable_mosaic.version = 11 : i64} {
  func.func @_ffn_kernel(%arg0: i32, %arg1: memref<32x128xf32, #tpu.memory_space<vmem>>, %arg2: memref<128x256xbf16, #tpu.memory_space<vmem>>, %arg3: memref<1x256xf32, #tpu.memory_space<vmem>>, %arg4: memref<256x128xbf16, #tpu.memory_space<vmem>>, %arg5: memref<1x128xf32, #tpu.memory_space<vmem>>, %arg6: memref<1x128xf32, #tpu.memory_space<vmem>>, %arg7: memref<1x128xf32, #tpu.memory_space<vmem>>, %arg8: memref<32x128xf32, #tpu.memory_space<vmem>>) attributes {dimension_semantics = [#tpu.dimension_semantics<parallel>], iteration_bounds = array<i64: 1>, scalar_prefetch = 0 : i64, scratch_operands = 0 : i64, tpu.core_type = #tpu.core_type<tc>, window_params = [{transform_indices = @transform_0, window_bounds = array<i64: 32, 128>}, {pipeline_mode = #tpu.pipeline_mode<synchronous>, transform_indices = @transform_1, window_bounds = array<i64: 128, 256>}, {pipeline_mode = #tpu.pipeline_mode<synchronous>, transform_indices = @transform_2, window_bounds = array<i64: 1, 256>}, {pipeline_mode = #tpu.pipeline_mode<synchronous>, transform_indices = @transform_3, window_bounds = array<i64: 256, 128>}, {pipeline_mode = #tpu.pipeline_mode<synchronous>, transform_indices = @transform_4, window_bounds = array<i64: 1, 128>}, {pipeline_mode = #tpu.pipeline_mode<synchronous>, transform_indices = @transform_5, window_bounds = array<i64: 1, 128>}, {pipeline_mode = #tpu.pipeline_mode<synchronous>, transform_indices = @transform_6, window_bounds = array<i64: 1, 128>}, {transform_indices = @transform_7, window_bounds = array<i64: 32, 128>}]} {
    %c0 = arith.constant 0 : index
    %c0_0 = arith.constant 0 : index
    %0 = vector.load %arg1[%c0, %c0_0] : memref<32x128xf32, #tpu.memory_space<vmem>>, vector<32x128xf32>
    %c0_1 = arith.constant 0 : index
    %c0_2 = arith.constant 0 : index
    %1 = vector.load %arg2[%c0_1, %c0_2] : memref<128x256xbf16, #tpu.memory_space<vmem>>, vector<128x256xbf16>
    %2 = arith.truncf %0 : vector<32x128xf32> to vector<32x128xbf16>
    %cst = arith.constant dense<0.000000e+00> : vector<32x256xf32>
    %3 = tpu.matmul %2, %1, %cst {dimension_numbers = #tpu.dot_dimension_numbers<[1], [0], [0], [1], [0, 0, 1, 1], [], []>} : vector<32x128xbf16>, vector<128x256xbf16>, vector<32x256xf32> -> vector<32x256xf32>
    %c0_3 = arith.constant 0 : index
    %c0_4 = arith.constant 0 : index
    %4 = vector.load %arg3[%c0_3, %c0_4] : memref<1x256xf32, #tpu.memory_space<vmem>>, vector<1x256xf32>
    %5 = vector.broadcast %4 : vector<1x256xf32> to vector<32x256xf32>
    %6 = arith.addf %3, %5 : vector<32x256xf32>
    %cst_5 = arith.constant 5.000000e-01 : f32
    %7 = vector.broadcast %cst_5 : f32 to vector<32x256xf32>
    %8 = arith.mulf %7, %6 : vector<32x256xf32>
    %cst_6 = arith.constant 4.471500e-02 : f32
    %9 = vector.broadcast %cst_6 : f32 to vector<32x256xf32>
    %10 = arith.mulf %9, %6 : vector<32x256xf32>
    %11 = arith.mulf %10, %6 : vector<32x256xf32>
    %12 = arith.mulf %11, %6 : vector<32x256xf32>
    %13 = arith.addf %6, %12 : vector<32x256xf32>
    %cst_7 = arith.constant 0.797884583 : f32
    %14 = vector.broadcast %cst_7 : f32 to vector<32x256xf32>
    %15 = arith.mulf %14, %13 : vector<32x256xf32>
    %16 = math.tanh %15 : vector<32x256xf32>
    %cst_8 = arith.constant 1.000000e+00 : f32
    %17 = vector.broadcast %cst_8 : f32 to vector<32x256xf32>
    %18 = arith.addf %17, %16 : vector<32x256xf32>
    %19 = arith.mulf %8, %18 : vector<32x256xf32>
    %c0_9 = arith.constant 0 : index
    %c0_10 = arith.constant 0 : index
    %20 = vector.load %arg4[%c0_9, %c0_10] : memref<256x128xbf16, #tpu.memory_space<vmem>>, vector<256x128xbf16>
    %21 = arith.truncf %19 : vector<32x256xf32> to vector<32x256xbf16>
    %cst_11 = arith.constant dense<0.000000e+00> : vector<32x128xf32>
    %22 = tpu.matmul %21, %20, %cst_11 {dimension_numbers = #tpu.dot_dimension_numbers<[1], [0], [0], [1], [0, 0, 1, 1], [], []>} : vector<32x256xbf16>, vector<256x128xbf16>, vector<32x128xf32> -> vector<32x128xf32>
    %c0_12 = arith.constant 0 : index
    %c0_13 = arith.constant 0 : index
    %23 = vector.load %arg5[%c0_12, %c0_13] : memref<1x128xf32, #tpu.memory_space<vmem>>, vector<1x128xf32>
    %24 = vector.broadcast %23 : vector<1x128xf32> to vector<32x128xf32>
    %25 = arith.addf %22, %24 : vector<32x128xf32>
    %26 = arith.addf %25, %0 : vector<32x128xf32>
    %c0_14 = arith.constant 0 : index
    %c0_15 = arith.constant 0 : index
    %27 = vector.load %arg6[%c0_14, %c0_15] : memref<1x128xf32, #tpu.memory_space<vmem>>, vector<1x128xf32>
    %c0_16 = arith.constant 0 : index
    %c0_17 = arith.constant 0 : index
    %28 = vector.load %arg7[%c0_16, %c0_17] : memref<1x128xf32, #tpu.memory_space<vmem>>, vector<1x128xf32>
    %cst_18 = arith.constant dense<0.000000e+00> : vector<32xf32>
    %29 = vector.multi_reduction <add>, %26, %cst_18 [1] : vector<32x128xf32> to vector<32xf32>
    %30 = vector.shape_cast %29 : vector<32xf32> to vector<32x1xf32>
    %cst_19 = arith.constant 1.280000e+02 : f32
    %31 = vector.broadcast %cst_19 : f32 to vector<32x1xf32>
    %32 = arith.divf %30, %31 : vector<32x1xf32>
    %33 = vector.broadcast %32 : vector<32x1xf32> to vector<32x128xf32>
    %34 = arith.subf %26, %33 : vector<32x128xf32>
    %35 = arith.mulf %34, %34 : vector<32x128xf32>
    %cst_20 = arith.constant dense<0.000000e+00> : vector<32xf32>
    %36 = vector.multi_reduction <add>, %35, %cst_20 [1] : vector<32x128xf32> to vector<32xf32>
    %37 = vector.shape_cast %36 : vector<32xf32> to vector<32x1xf32>
    %cst_21 = arith.constant 1.280000e+02 : f32
    %38 = vector.broadcast %cst_21 : f32 to vector<32x1xf32>
    %39 = arith.divf %37, %38 : vector<32x1xf32>
    %40 = vector.broadcast %32 : vector<32x1xf32> to vector<32x128xf32>
    %41 = arith.subf %26, %40 : vector<32x128xf32>
    %cst_22 = arith.constant 9.99999996E-13 : f32
    %42 = vector.broadcast %cst_22 : f32 to vector<32x1xf32>
    %43 = arith.addf %39, %42 : vector<32x1xf32>
    %44 = math.rsqrt %43 : vector<32x1xf32>
    %45 = vector.broadcast %44 : vector<32x1xf32> to vector<32x128xf32>
    %46 = arith.mulf %41, %45 : vector<32x128xf32>
    %47 = vector.broadcast %27 : vector<1x128xf32> to vector<32x128xf32>
    %48 = arith.mulf %46, %47 : vector<32x128xf32>
    %49 = vector.broadcast %28 : vector<1x128xf32> to vector<32x128xf32>
    %50 = arith.addf %48, %49 : vector<32x128xf32>
    %c0_23 = arith.constant 0 : index
    %c0_24 = arith.constant 0 : index
    %51 = vector.load %arg8[%c0_23, %c0_24] : memref<32x128xf32, #tpu.memory_space<vmem>>, vector<32x128xf32>
    tpu.vector_store %arg8[%c0_23, %c0_24], %50 {strides = array<i32>} : memref<32x128xf32, #tpu.memory_space<vmem>>, vector<32x128xf32>,
    return
  }
  func.func @transform_0(%arg0: i32) -> (i32, i32) {
    %c0_i32 = arith.constant 0 : i32
    %c0_i32_0 = arith.constant 0 : i32
    return %arg0, %c0_i32 : i32, i32
  }
  func.func @transform_1(%arg0: i32) -> (i32, i32) {
    %c0_i32 = arith.constant 0 : i32
    %c0_i32_0 = arith.constant 0 : i32
    %c0_i32_1 = arith.constant 0 : i32
    return %c0_i32, %c0_i32_0 : i32, i32
  }
  func.func @transform_2(%arg0: i32) -> (i32, i32) {
    %c0_i32 = arith.constant 0 : i32
    %c0_i32_0 = arith.constant 0 : i32
    %c0_i32_1 = arith.constant 0 : i32
    return %c0_i32, %c0_i32_0 : i32, i32
  }
  func.func @transform_3(%arg0: i32) -> (i32, i32) {
    %c0_i32 = arith.constant 0 : i32
    %c0_i32_0 = arith.constant 0 : i32
    %c0_i32_1 = arith.constant 0 : i32
    return %c0_i32, %c0_i32_0 : i32, i32
  }
  func.func @transform_4(%arg0: i32) -> (i32, i32) {
    %c0_i32 = arith.constant 0 : i32
    %c0_i32_0 = arith.constant 0 : i32
    %c0_i32_1 = arith.constant 0 : i32
    return %c0_i32, %c0_i32_0 : i32, i32
  }
  func.func @transform_5(%arg0: i32) -> (i32, i32) {
    %c0_i32 = arith.constant 0 : i32
    %c0_i32_0 = arith.constant 0 : i32
    %c0_i32_1 = arith.constant 0 : i32
    return %c0_i32, %c0_i32_0 : i32, i32
  }
  func.func @transform_6(%arg0: i32) -> (i32, i32) {
    %c0_i32 = arith.constant 0 : i32
    %c0_i32_0 = arith.constant 0 : i32
    %c0_i32_1 = arith.constant 0 : i32
    return %c0_i32, %c0_i32_0 : i32, i32
  }
  func.func @transform_7(%arg0: i32) -> (i32, i32) {
    %c0_i32 = arith.constant 0 : i32
    %c0_i32_0 = arith.constant 0 : i32
    return %arg0, %c0_i32 : i32, i32
  }
}

module attributes {stable_mosaic.version = 11 : i64} {
  func.func @_mlm_transform_kernel(%arg0: i32, %arg1: memref<8x128xf32, #tpu.memory_space<vmem>>, %arg2: memref<128x128xbf16, #tpu.memory_space<vmem>>, %arg3: memref<1x128xf32, #tpu.memory_space<vmem>>, %arg4: memref<1x128xf32, #tpu.memory_space<vmem>>, %arg5: memref<1x128xf32, #tpu.memory_space<vmem>>, %arg6: memref<8x128xf32, #tpu.memory_space<vmem>>) attributes {dimension_semantics = [#tpu.dimension_semantics<parallel>], iteration_bounds = array<i64: 1>, scalar_prefetch = 0 : i64, scratch_operands = 0 : i64, tpu.core_type = #tpu.core_type<tc>, window_params = [{transform_indices = @transform_0, window_bounds = array<i64: 8, 128>}, {pipeline_mode = #tpu.pipeline_mode<synchronous>, transform_indices = @transform_1, window_bounds = array<i64: 128, 128>}, {pipeline_mode = #tpu.pipeline_mode<synchronous>, transform_indices = @transform_2, window_bounds = array<i64: 1, 128>}, {pipeline_mode = #tpu.pipeline_mode<synchronous>, transform_indices = @transform_3, window_bounds = array<i64: 1, 128>}, {pipeline_mode = #tpu.pipeline_mode<synchronous>, transform_indices = @transform_4, window_bounds = array<i64: 1, 128>}, {transform_indices = @transform_5, window_bounds = array<i64: 8, 128>}]} {
    %c0 = arith.constant 0 : index
    %c0_0 = arith.constant 0 : index
    %0 = vector.load %arg1[%c0, %c0_0] : memref<8x128xf32, #tpu.memory_space<vmem>>, vector<8x128xf32>
    %c0_1 = arith.constant 0 : index
    %c0_2 = arith.constant 0 : index
    %1 = vector.load %arg2[%c0_1, %c0_2] : memref<128x128xbf16, #tpu.memory_space<vmem>>, vector<128x128xbf16>
    %2 = arith.truncf %0 : vector<8x128xf32> to vector<8x128xbf16>
    %cst = arith.constant dense<0.000000e+00> : vector<8x128xf32>
    %3 = tpu.matmul %2, %1, %cst {dimension_numbers = #tpu.dot_dimension_numbers<[1], [0], [0], [1], [0, 0, 1, 1], [], []>} : vector<8x128xbf16>, vector<128x128xbf16>, vector<8x128xf32> -> vector<8x128xf32>
    %c0_3 = arith.constant 0 : index
    %c0_4 = arith.constant 0 : index
    %4 = vector.load %arg3[%c0_3, %c0_4] : memref<1x128xf32, #tpu.memory_space<vmem>>, vector<1x128xf32>
    %5 = vector.broadcast %4 : vector<1x128xf32> to vector<8x128xf32>
    %6 = arith.addf %3, %5 : vector<8x128xf32>
    %cst_5 = arith.constant 5.000000e-01 : f32
    %7 = vector.broadcast %cst_5 : f32 to vector<8x128xf32>
    %8 = arith.mulf %7, %6 : vector<8x128xf32>
    %cst_6 = arith.constant 4.471500e-02 : f32
    %9 = vector.broadcast %cst_6 : f32 to vector<8x128xf32>
    %10 = arith.mulf %9, %6 : vector<8x128xf32>
    %11 = arith.mulf %10, %6 : vector<8x128xf32>
    %12 = arith.mulf %11, %6 : vector<8x128xf32>
    %13 = arith.addf %6, %12 : vector<8x128xf32>
    %cst_7 = arith.constant 0.797884583 : f32
    %14 = vector.broadcast %cst_7 : f32 to vector<8x128xf32>
    %15 = arith.mulf %14, %13 : vector<8x128xf32>
    %16 = math.tanh %15 : vector<8x128xf32>
    %cst_8 = arith.constant 1.000000e+00 : f32
    %17 = vector.broadcast %cst_8 : f32 to vector<8x128xf32>
    %18 = arith.addf %17, %16 : vector<8x128xf32>
    %19 = arith.mulf %8, %18 : vector<8x128xf32>
    %c0_9 = arith.constant 0 : index
    %c0_10 = arith.constant 0 : index
    %20 = vector.load %arg4[%c0_9, %c0_10] : memref<1x128xf32, #tpu.memory_space<vmem>>, vector<1x128xf32>
    %c0_11 = arith.constant 0 : index
    %c0_12 = arith.constant 0 : index
    %21 = vector.load %arg5[%c0_11, %c0_12] : memref<1x128xf32, #tpu.memory_space<vmem>>, vector<1x128xf32>
    %cst_13 = arith.constant dense<0.000000e+00> : vector<8xf32>
    %22 = vector.multi_reduction <add>, %19, %cst_13 [1] : vector<8x128xf32> to vector<8xf32>
    %23 = vector.shape_cast %22 : vector<8xf32> to vector<8x1xf32>
    %cst_14 = arith.constant 1.280000e+02 : f32
    %24 = vector.broadcast %cst_14 : f32 to vector<8x1xf32>
    %25 = arith.divf %23, %24 : vector<8x1xf32>
    %26 = vector.broadcast %25 : vector<8x1xf32> to vector<8x128xf32>
    %27 = arith.subf %19, %26 : vector<8x128xf32>
    %28 = arith.mulf %27, %27 : vector<8x128xf32>
    %cst_15 = arith.constant dense<0.000000e+00> : vector<8xf32>
    %29 = vector.multi_reduction <add>, %28, %cst_15 [1] : vector<8x128xf32> to vector<8xf32>
    %30 = vector.shape_cast %29 : vector<8xf32> to vector<8x1xf32>
    %cst_16 = arith.constant 1.280000e+02 : f32
    %31 = vector.broadcast %cst_16 : f32 to vector<8x1xf32>
    %32 = arith.divf %30, %31 : vector<8x1xf32>
    %33 = vector.broadcast %25 : vector<8x1xf32> to vector<8x128xf32>
    %34 = arith.subf %19, %33 : vector<8x128xf32>
    %cst_17 = arith.constant 9.99999996E-13 : f32
    %35 = vector.broadcast %cst_17 : f32 to vector<8x1xf32>
    %36 = arith.addf %32, %35 : vector<8x1xf32>
    %37 = math.rsqrt %36 : vector<8x1xf32>
    %38 = vector.broadcast %37 : vector<8x1xf32> to vector<8x128xf32>
    %39 = arith.mulf %34, %38 : vector<8x128xf32>
    %40 = vector.broadcast %20 : vector<1x128xf32> to vector<8x128xf32>
    %41 = arith.mulf %39, %40 : vector<8x128xf32>
    %42 = vector.broadcast %21 : vector<1x128xf32> to vector<8x128xf32>
    %43 = arith.addf %41, %42 : vector<8x128xf32>
    %c0_18 = arith.constant 0 : index
    %c0_19 = arith.constant 0 : index
    %44 = vector.load %arg6[%c0_18, %c0_19] : memref<8x128xf32, #tpu.memory_space<vmem>>, vector<8x128xf32>
    tpu.vector_store %arg6[%c0_18, %c0_19], %43 {strides = array<i32>} : memref<8x128xf32, #tpu.memory_space<vmem>>, vector<8x128xf32>,
    return
  }
  func.func @transform_0(%arg0: i32) -> (i32, i32) {
    %c0_i32 = arith.constant 0 : i32
    %c0_i32_0 = arith.constant 0 : i32
    return %arg0, %c0_i32 : i32, i32
  }
  func.func @transform_1(%arg0: i32) -> (i32, i32) {
    %c0_i32 = arith.constant 0 : i32
    %c0_i32_0 = arith.constant 0 : i32
    %c0_i32_1 = arith.constant 0 : i32
    return %c0_i32, %c0_i32_0 : i32, i32
  }
  func.func @transform_2(%arg0: i32) -> (i32, i32) {
    %c0_i32 = arith.constant 0 : i32
    %c0_i32_0 = arith.constant 0 : i32
    %c0_i32_1 = arith.constant 0 : i32
    return %c0_i32, %c0_i32_0 : i32, i32
  }
  func.func @transform_3(%arg0: i32) -> (i32, i32) {
    %c0_i32 = arith.constant 0 : i32
    %c0_i32_0 = arith.constant 0 : i32
    %c0_i32_1 = arith.constant 0 : i32
    return %c0_i32, %c0_i32_0 : i32, i32
  }
  func.func @transform_4(%arg0: i32) -> (i32, i32) {
    %c0_i32 = arith.constant 0 : i32
    %c0_i32_0 = arith.constant 0 : i32
    %c0_i32_1 = arith.constant 0 : i32
    return %c0_i32, %c0_i32_0 : i32, i32
  }
  func.func @transform_5(%arg0: i32) -> (i32, i32) {
    %c0_i32 = arith.constant 0 : i32
    %c0_i32_0 = arith.constant 0 : i32
    return %arg0, %c0_i32 : i32, i32
  }
}

module attributes {stable_mosaic.version = 11 : i64} {
  func.func @_mlm_decoder_kernel(%arg0: i32, %arg1: memref<8x128xf32, #tpu.memory_space<vmem>>, %arg2: memref<512x128xbf16, #tpu.memory_space<vmem>>, %arg3: memref<1x512xf32, #tpu.memory_space<vmem>>, %arg4: memref<8x512xf32, #tpu.memory_space<vmem>>) attributes {dimension_semantics = [#tpu.dimension_semantics<parallel>], iteration_bounds = array<i64: 1>, scalar_prefetch = 0 : i64, scratch_operands = 0 : i64, tpu.core_type = #tpu.core_type<tc>, window_params = [{pipeline_mode = #tpu.pipeline_mode<synchronous>, transform_indices = @transform_0, window_bounds = array<i64: 8, 128>}, {transform_indices = @transform_1, window_bounds = array<i64: 512, 128>}, {transform_indices = @transform_2, window_bounds = array<i64: 1, 512>}, {transform_indices = @transform_3, window_bounds = array<i64: 8, 512>}]} {
    %c0 = arith.constant 0 : index
    %c0_0 = arith.constant 0 : index
    %0 = vector.load %arg1[%c0, %c0_0] : memref<8x128xf32, #tpu.memory_space<vmem>>, vector<8x128xf32>
    %c0_1 = arith.constant 0 : index
    %c0_2 = arith.constant 0 : index
    %1 = vector.load %arg2[%c0_1, %c0_2] : memref<512x128xbf16, #tpu.memory_space<vmem>>, vector<512x128xbf16>
    %2 = arith.truncf %0 : vector<8x128xf32> to vector<8x128xbf16>
    %cst = arith.constant dense<0.000000e+00> : vector<8x512xf32>
    %3 = tpu.matmul %2, %1, %cst {dimension_numbers = #tpu.dot_dimension_numbers<[1], [1], [0], [0], [0, 0, 1, 0], [], []>} : vector<8x128xbf16>, vector<512x128xbf16>, vector<8x512xf32> -> vector<8x512xf32>
    %c0_3 = arith.constant 0 : index
    %c0_4 = arith.constant 0 : index
    %4 = vector.load %arg3[%c0_3, %c0_4] : memref<1x512xf32, #tpu.memory_space<vmem>>, vector<1x512xf32>
    %5 = vector.broadcast %4 : vector<1x512xf32> to vector<8x512xf32>
    %6 = arith.addf %3, %5 : vector<8x512xf32>
    %c0_5 = arith.constant 0 : index
    %c0_6 = arith.constant 0 : index
    %7 = vector.load %arg4[%c0_5, %c0_6] : memref<8x512xf32, #tpu.memory_space<vmem>>, vector<8x512xf32>
    tpu.vector_store %arg4[%c0_5, %c0_6], %6 {strides = array<i32>} : memref<8x512xf32, #tpu.memory_space<vmem>>, vector<8x512xf32>,
    return
  }
  func.func @transform_0(%arg0: i32) -> (i32, i32) {
    %c0_i32 = arith.constant 0 : i32
    %c0_i32_0 = arith.constant 0 : i32
    %c0_i32_1 = arith.constant 0 : i32
    return %c0_i32, %c0_i32_0 : i32, i32
  }
  func.func @transform_1(%arg0: i32) -> (i32, i32) {
    %c0_i32 = arith.constant 0 : i32
    %c0_i32_0 = arith.constant 0 : i32
    return %arg0, %c0_i32 : i32, i32
  }
  func.func @transform_2(%arg0: i32) -> (i32, i32) {
    %c0_i32 = arith.constant 0 : i32
    %c0_i32_0 = arith.constant 0 : i32
    return %c0_i32, %arg0 : i32, i32
  }
  func.func @transform_3(%arg0: i32) -> (i32, i32) {
    %c0_i32 = arith.constant 0 : i32
    %c0_i32_0 = arith.constant 0 : i32
    return %c0_i32, %arg0 : i32, i32
  }
}

</mosaic_0001>

<bundles_post_ra>
// kernel: _lambda_.7
= control target key start
LH: loop header
LB: loop body
LE: loop exit
PB: predicated region body
PF: predicated region fallthrough
CT: control target
= control target key end

     0   :  { %s153_s0 = inlined_call_operand.vmem [shape: f32[32,128], index: 0, kind: input, shape index: {}]   ;;  %s154_s1 = inlined_call_operand.vmem [shape: f32[1,128], index: 1, kind: input, shape index: {}]   ;;  %s155_s2 = inlined_call_operand.vmem [shape: f32[1,128], index: 2, kind: input, shape index: {}]   ;;  %s156_s3 = inlined_call_operand.vmem [shape: f32[32,128], index: 3, kind: output, shape index: {}]  }
   0x1   :  { %v14_v0 = vld [vmem:[%s153_s0] sm:$0xff]  ;;  %v16_v1 = vld [vmem:[%s153_s0 + $0x10] sm:$0xff]  ;;  %v15_v2 = vld [vmem:[%s153_s0 + $0x8] sm:$0xff] }
   0x2   :  { %20 = vadd.xlane.f32.xlu0 %v14_v0  ;;  %24 = vadd.xlane.f32.xlu1 %v16_v1  ;;  %v17_v3 = vld [vmem:[%s153_s0 + $0x18] sm:$0xff]  ;;  %v93_v33 = vld [vmem:[%s154_s1] ss:$0 sm:$0xff] }
   0x3   :  { %v94_v35 = vld [vmem:[%s155_s2] ss:$0 sm:$0xff] }
   0x6   :  { %22 = vadd.xlane.f32.xlu0 %v15_v2  ;;  %26 = vadd.xlane.f32.xlu1 %v17_v3 }
  0x8b   :  { %v21_v4 = vpop.xlane.xlu0 %20  ;;  %v25_v5 = vpop.xlane.xlu1 %24 }
  0x8c   :  { %v29_v6 = vmul.f32 0.0078125, %v21_v4  ;;  %v31_v7 = vmul.f32 0.0078125, %v25_v5 }
  0x8e   :  { %v33_v8 = vsub.f32 %v14_v0, %v29_v6  ;;  %v35_v9 = vsub.f32 %v16_v1, %v31_v7 }
  0x8f   :  { %v23_v10 = vpop.xlane.xlu0 %22  ;;  %v27_v11 = vpop.xlane.xlu1 %26 }
  0x90   :  { %v30_v12 = vmul.f32 0.0078125, %v23_v10  ;;  %v37_v13 = vmul.f32 %v33_v8, %v33_v8  ;;  %v32_v14 = vmul.f32 0.0078125, %v27_v11  ;;  %v39_v17 = vmul.f32 %v35_v9, %v35_v9 }
  0x92   :  { %v34_v15 = vsub.f32 %v15_v2, %v30_v12  ;;  %41 = vadd.xlane.f32.xlu0 %v37_v13  ;;  %v36_v16 = vsub.f32 %v17_v3, %v32_v14 }
  0x94   :  { %v38_v18 = vmul.f32 %v34_v15, %v34_v15  ;;  %v40_v19 = vmul.f32 %v36_v16, %v36_v16 }
  0x96   :  { %45 = vadd.xlane.f32.xlu0 %v39_v17  ;;  %43 = vadd.xlane.f32.xlu1 %v38_v18 }
  0x9a   :  { %47 = vadd.xlane.f32.xlu1 %v40_v19 }
 0x11b   :  { %v42_v20 = vpop.xlane.xlu0 %41 }
 0x11c   :  { %v49_v21 = vmul.f32 0.0078125, %v42_v20 }
 0x11e   :  { %v53_v22 = vadd.f32 1e-12, %v49_v21 }
 0x11f   :  { %v44_v23 = vpop.xlane.xlu1 %43  ;;  %v46_v24 = vpop.xlane.xlu0 %45 }
 0x120   :  { %95 = vrsqrt.f32 %v53_v22  ;;  %v50_v25 = vmul.f32 0.0078125, %v44_v23  ;;  %v51_v26 = vmul.f32 0.0078125, %v46_v24 }
 0x122   :  { %v54_v27 = vadd.f32 1e-12, %v50_v25  ;;  %v55_v28 = vadd.f32 1e-12, %v51_v26 }
 0x123   :  { %v48_v29 = vpop.xlane.xlu1 %47 }
 0x124   :  { %97 = vrsqrt.f32 %v54_v27  ;;  %v52_v30 = vmul.f32 0.0078125, %v48_v29 }
 0x125   :  { %99 = vrsqrt.f32 %v55_v28 }
 0x126   :  { %v56_v31 = vadd.f32 1e-12, %v52_v30 }
 0x128   :  { %101 = vrsqrt.f32 %v56_v31 }
 0x12d   :  { %v96_v32 = vpop.eup %95 }
 0x12e   :  { %v61_v34 = vmul.f32 %v96_v32, %v33_v8 }
 0x130   :  { %v71_v36 = vmul.f32 %v93_v33, %v61_v34 }
 0x131   :  { %v98_v37 = vpop.eup %97 }
 0x132   :  { %v100_v38 = vpop.eup %99  ;;  %v81_v39 = vadd.f32 %v94_v35, %v71_v36  ;;  %v62_v40 = vmul.f32 %v98_v37, %v34_v15 }
 0x133   :  { %v63_v41 = vmul.f32 %v100_v38, %v35_v9 }
 0x134   :  { %85 = vst [vmem:[%s156_s3] sm:$0xff] %v81_v39  ;;  %v72_v42 = vmul.f32 %v93_v33, %v62_v40 }
 0x135   :  { %v102_v43 = vpop.eup %101  ;;  %v73_v44 = vmul.f32 %v93_v33, %v63_v41 }
 0x136   :  { %v82_v45 = vadd.f32 %v94_v35, %v72_v42  ;;  %v64_v46 = vmul.f32 %v102_v43, %v36_v16 }
 0x137   :  { %v83_v47 = vadd.f32 %v94_v35, %v73_v44 }
 0x138   :  { %86 = vst [vmem:[%s156_s3 + $0x8] sm:$0xff] %v82_v45  ;;  %v74_v48 = vmul.f32 %v93_v33, %v64_v46 }
 0x139   :  { %87 = vst [vmem:[%s156_s3 + $0x10] sm:$0xff] %v83_v47 }
 0x13a   :  { %v84_v49 = vadd.f32 %v94_v35, %v74_v48 }
 0x13c   :  { %88 = vst [vmem:[%s156_s3 + $0x18] sm:$0xff] %v84_v49 }

// kernel: _lambda_.9
= control target key start
LH: loop header
LB: loop body
LE: loop exit
PB: predicated region body
PF: predicated region fallthrough
CT: control target
= control target key end

     0   :  { %v661_v1 = vmov 0   ;;  %v51_v39 = vlaneseq  ;;  %s878_s1 = inlined_call_operand.vmem [shape: bf16[128,256], index: 1, kind: input, shape index: {}]   ;;  %s879_s0 = inlined_call_operand.vmem [shape: f32[32,128], index: 0, kind: input, shape index: {}]   ;;  %s880_s3 = inlined_call_operand.vmem [shape: bf16[256,128], index: 3, kind: input, shape index: {}]   ;;  %s881_s2 = inlined_call_operand.vmem [shape: f32[1,256], index: 2, kind: input, shape index: {}]   ;;  %s882_s4 = inlined_call_operand.vmem [shape: f32[1,128], index: 4, kind: input, shape index: {}]   ;;  %s883_s5 = inlined_call_operand.vmem [shape: f32[1,128], index: 5, kind: input, shape index: {}]   ;;  %s884_s6 = inlined_call_operand.vmem [shape: f32[1,128], index: 6, kind: input, shape index: {}]   ;;  %s885_s7 = inlined_call_operand.vmem [shape: f32[32,128], index: 7, kind: output, shape index: {}]  }
   0x1   :  { %v597_v0 = vld [vmem:[%s878_s1 + $0x74] ss:$8 sps:$4 sm:$0xff]   ;;  %173 = vmatprep.mubr.bf16.mxu0 %v661_v1  ;;  %v599_v2 = vld [vmem:[%s878_s1 + $0x70] ss:$8 sps:$4 sm:$0xff]   ;;  %v600_v3 = vld [vmem:[%s878_s1 + $0x64] ss:$8 sps:$4 sm:$0xff]  }
   0x2   :  { %141 = vmatprep.subr.bf16.mxu0 %v597_v0  ;;  %v602_v4 = vld [vmem:[%s878_s1 + $0x60] ss:$8 sps:$4 sm:$0xff]   ;;  %v603_v5 = vld [vmem:[%s878_s1 + $0x54] ss:$8 sps:$4 sm:$0xff]   ;;  %v605_v6 = vld [vmem:[%s878_s1 + $0x50] ss:$8 sps:$4 sm:$0xff]  }
   0x3   :  { %142 = vmatpush1.bf16.msra.mxu0 %v599_v2  ;;  %v606_v7 = vld [vmem:[%s878_s1 + $0x44] ss:$8 sps:$4 sm:$0xff]   ;;  %v608_v8 = vld [vmem:[%s878_s1 + $0x40] ss:$8 sps:$4 sm:$0xff]   ;;  %v609_v9 = vld [vmem:[%s878_s1 + $0x34] ss:$8 sps:$4 sm:$0xff]  }
   0x4   :  { %143 = vmatprep.subr.bf16.mxu0 %v600_v3  ;;  %v611_v10 = vld [vmem:[%s878_s1 + $0x30] ss:$8 sps:$4 sm:$0xff]   ;;  %v612_v11 = vld [vmem:[%s878_s1 + $0x24] ss:$8 sps:$4 sm:$0xff]   ;;  %v614_v12 = vld [vmem:[%s878_s1 + $0x20] ss:$8 sps:$4 sm:$0xff]  }
   0x5   :  { %v615_v13 = vld [vmem:[%s878_s1 + $0x14] ss:$8 sps:$4 sm:$0xff]   ;;  %v617_v14 = vld [vmem:[%s878_s1 + $0x10] ss:$8 sps:$4 sm:$0xff]   ;;  %v618_v15 = vld [vmem:[%s878_s1 + $0x4] ss:$8 sps:$4 sm:$0xff]  }
   0x6   :  { %v620_v16 = vld [vmem:[%s878_s1] ss:$8 sps:$4 sm:$0xff]   ;;  %v765_v20 = vld [vmem:[%s879_s0 + $0x10] sm:$0xff]  ;;  %v770_v21 = vld [vmem:[%s879_s0 + $0x18] sm:$0xff]  ;;  %v52_v40 = vshrl.u32 %v51_v39, 7 }
   0x7   :  { %144 = vmatpush1.bf16.msra.mxu0 %v602_v4  ;;  %v753_v17 = vld [vmem:[%s879_s0] sm:$0xff]  ;;  %v758_v18 = vld [vmem:[%s879_s0 + $0x8] sm:$0xff]  ;;  %v48_v22 = vpack.c.bf16 %v770_v21, %v765_v20  ;;  %v621_v23 = vld [vmem:[%s880_s3 + $0x78] sm:$0xff]  }
   0x8   :  { %145 = vmatprep.subr.bf16.mxu0 %v603_v5  ;;  %v47_v19 = vpack.c.bf16 %v758_v18, %v753_v17  ;;  %v622_v24 = vld [vmem:[%s880_s3 + $0x38] sm:$0xff]   ;;  %568 = vmatprep.subr.bf16.mxu1 %v621_v23  ;;  %v623_v25 = vld [vmem:[%s880_s3 + $0x70] sm:$0xff]   ;;  %v625_v27 = vld [vmem:[%s880_s3 + $0x68] sm:$0xff]   ;;  %v53_v41 = vsub.s32 0, %v52_v40  ;;  %v57_v43 = vsub.s32 1, %v52_v40 }
   0x9   :  { %569 = vmatpush3.bf16.msra.mxu1 %v622_v24  ;;  %v624_v26 = vld [vmem:[%s880_s3 + $0x30] sm:$0xff]   ;;  %v626_v28 = vld [vmem:[%s880_s3 + $0x28] sm:$0xff]   ;;  %v627_v29 = vld [vmem:[%s880_s3 + $0x60] sm:$0xff]  }
   0xa   :  { %570 = vmatprep.subr.bf16.mxu1 %v623_v25  ;;  %v628_v30 = vld [vmem:[%s880_s3 + $0x20] sm:$0xff]   ;;  %v629_v31 = vld [vmem:[%s880_s3 + $0x58] sm:$0xff]   ;;  %v631_v33 = vld [vmem:[%s880_s3 + $0x50] sm:$0xff]  }
   0xb   :  { %146 = vmatpush1.bf16.msra.mxu0 %v605_v6  ;;  %v630_v32 = vld [vmem:[%s880_s3 + $0x18] sm:$0xff]   ;;  %v632_v34 = vld [vmem:[%s880_s3 + $0x10] sm:$0xff]   ;;  %v633_v35 = vld [vmem:[%s880_s3 + $0x48] sm:$0xff]  }
   0xc   :  { %147 = vmatprep.subr.bf16.mxu0 %v606_v7  ;;  %v634_v36 = vld [vmem:[%s880_s3 + $0x8] sm:$0xff]   ;;  %v635_v37 = vld [vmem:[%s880_s3 + $0x40] sm:$0xff]  }
   0xd   :  { %571 = vmatpush3.bf16.msra.mxu1 %v624_v26  ;;  %v636_v38 = vld [vmem:[%s880_s3] sm:$0xff]  }
   0xe   :  { %572 = vmatprep.subr.bf16.mxu1 %v625_v27  ;;  %v49_v42 = vld [vmem:[%s881_s2] sm:$0x3] }
   0xf   :  { %148 = vmatpush1.bf16.msra.mxu0 %v608_v8  ;;  %v54_v44 = vrot.slane %v49_v42, %v53_v41  ;;  %v58_v45 = vrot.slane %v49_v42, %v57_v43 }
  0x10   :  { %149 = vmatprep.subr.bf16.mxu0 %v609_v9 }
  0x11   :  { %573 = vmatpush3.bf16.msra.mxu1 %v626_v28 }
  0x12   :  { %574 = vmatprep.subr.bf16.mxu1 %v627_v29 }
  0x13   :  { %150 = vmatpush1.bf16.msra.mxu0 %v611_v10 }
  0x14   :  { %151 = vmatprep.subr.bf16.mxu0 %v612_v11 }
  0x15   :  { %575 = vmatpush3.bf16.msra.mxu1 %v628_v30 }
  0x16   :  { %576 = vmatprep.subr.bf16.mxu1 %v629_v31 }
  0x17   :  { %152 = vmatpush1.bf16.msra.mxu0 %v614_v12 }
  0x18   :  { %153 = vmatprep.subr.bf16.mxu0 %v615_v13 }
  0x19   :  { %577 = vmatpush3.bf16.msra.mxu1 %v630_v32 }
  0x1a   :  { %578 = vmatprep.subr.bf16.mxu1 %v631_v33 }
  0x1b   :  { %154 = vmatpush1.bf16.msra.mxu0 %v617_v14 }
  0x1c   :  { %155 = vmatprep.subr.bf16.mxu0 %v618_v15 }
  0x1d   :  { %579 = vmatpush3.bf16.msra.mxu1 %v632_v34 }
  0x1e   :  { %580 = vmatprep.subr.bf16.mxu1 %v633_v35 }
  0x1f   :  { %156 = vmatpush1.bf16.msra.mxu0 %v620_v16 }
  0x21   :  { %581 = vmatpush3.bf16.msra.mxu1 %v634_v36 }
  0x22   :  { %174 = vmatmul.mubr.bf16.vlgmr.msra.gmra.mxu0 %v47_v19  ;;  %582 = vmatprep.subr.bf16.mxu1 %v635_v37 }
  0x23   :  { %183 = vmatprep.mubr.bf16.mxu0 %v661_v1 }
  0x25   :  { %583 = vmatpush3.bf16.msra.mxu1 %v636_v38 }
  0x2a   :  { %184 = vmatmul.mubr.bf16.gmra.mxu0 %v48_v22 }
  0xe2   :  { %v175_v46 = vpop.f32.mrf.mxu0 }
  0xe3   :  { %v825_v47 = vadd.f32 %v175_v46, %v54_v44 }
  0xe4   :  { %v177_v48 = vpop.f32.mrf.mxu0 }
  0xe5   :  { %v202_v49 = vmul.f32 0.044715, %v825_v47  ;;  %v828_v50 = vadd.f32 %v177_v48, %v58_v45 }
  0xe6   :  { %v179_v51 = vpop.f32.mrf.mxu0 }
  0xe7   :  { %v210_v52 = vmul.f32 %v202_v49, %v825_v47  ;;  %v203_v53 = vmul.f32 0.044715, %v828_v50  ;;  %v180_v54 = vadd.f32 %v179_v51, %v54_v44 }
  0xe8   :  { %v181_v55 = vpop.f32.mrf.mxu0 }
  0xe9   :  { %v218_v56 = vmul.f32 %v210_v52, %v825_v47  ;;  %v204_v57 = vmul.f32 0.044715, %v180_v54  ;;  %v182_v58 = vadd.f32 %v181_v55, %v58_v45  ;;  %v211_v59 = vmul.f32 %v203_v53, %v828_v50 }
  0xea   :  { %v185_v60 = vpop.f32.mrf.mxu0  ;;  %v196_v49 = vmul.f32 0.5, %v180_v54  ;;  %v195_v52 = vmul.f32 0.5, %v828_v50 }
  0xeb   :  { %v212_v61 = vmul.f32 %v204_v57, %v180_v54  ;;  %v205_v62 = vmul.f32 0.044715, %v182_v58  ;;  %v834_v63 = vadd.f32 %v185_v60, %v54_v44  ;;  %v219_v1 = vmul.f32 %v211_v59, %v828_v50 }
  0xec   :  { %v187_v0 = vpop.f32.mrf.mxu0  ;;  %v226_v2 = vadd.f32 %v218_v56, %v825_v47  ;;  %v197_v53 = vmul.f32 0.5, %v182_v58  ;;  %v194_v56 = vmul.f32 0.5, %v825_v47 }
  0xed   :  { %v220_v3 = vmul.f32 %v212_v61, %v180_v54  ;;  %v206_v4 = vmul.f32 0.044715, %v834_v63  ;;  %v839_v5 = vadd.f32 %v187_v0, %v58_v45  ;;  %v213_v6 = vmul.f32 %v205_v62, %v182_v58 }
  0xee   :  { %v189_v7 = vpop.f32.mrf.mxu0  ;;  %v227_v8 = vadd.f32 %v219_v1, %v828_v50  ;;  %v234_v9 = vmul.f32 0.7978846, %v226_v2 }
  0xef   :  { %v214_v10 = vmul.f32 %v206_v4, %v834_v63  ;;  %v207_v11 = vmul.f32 0.044715, %v839_v5  ;;  %v190_v12 = vadd.f32 %v189_v7, %v54_v44  ;;  %v221_v13 = vmul.f32 %v213_v6, %v182_v58 }
  0xf0   :  { %v191_v14 = vpop.f32.mrf.mxu0  ;;  %v235_v15 = vmul.f32 0.7978846, %v227_v8  ;;  %v228_v16 = vadd.f32 %v220_v3, %v180_v54  ;;  %v199_v54 = vmul.f32 0.5, %v839_v5 }
  0xf1   :  { %v222_v19 = vmul.f32 %v214_v10, %v834_v63  ;;  %v215_v22 = vmul.f32 %v207_v11, %v839_v5  ;;  %v208_v23 = vmul.f32 0.044715, %v190_v12  ;;  %v192_v24 = vadd.f32 %v191_v14, %v58_v45 }
  0xf2   :  { %v229_v25 = vadd.f32 %v221_v13, %v182_v58  ;;  %637 = vtanh.f32 %v235_v15  ;;  %v236_v26 = vmul.f32 0.7978846, %v228_v16  ;;  %v200_v8 = vmul.f32 0.5, %v190_v12 }
  0xf3   :  { %v223_v27 = vmul.f32 %v215_v22, %v839_v5  ;;  %v216_v28 = vmul.f32 %v208_v23, %v190_v12  ;;  %v209_v29 = vmul.f32 0.044715, %v192_v24  ;;  %639 = vtanh.f32 %v234_v9 }
  0xf4   :  { %v237_v30 = vmul.f32 0.7978846, %v229_v25  ;;  %641 = vtanh.f32 %v236_v26  ;;  %v230_v31 = vadd.f32 %v222_v19, %v834_v63  ;;  %v201_v50 = vmul.f32 0.5, %v192_v24 }
  0xf5   :  { %v224_v32 = vmul.f32 %v216_v28, %v190_v12  ;;  %v217_v33 = vmul.f32 %v209_v29, %v192_v24  ;;  %v231_v34 = vadd.f32 %v223_v27, %v839_v5  ;;  %v198_v11 = vmul.f32 0.5, %v834_v63  ;;  %v549_v5 = vld [vmem:[%s882_s4] ss:$0 sm:$0xff] }
  0xf6   :  { %643 = vtanh.f32 %v237_v30  ;;  %v238_v35 = vmul.f32 0.7978846, %v230_v31 }
  0xf7   :  { %v225_v36 = vmul.f32 %v217_v33, %v192_v24  ;;  %v239_v37 = vmul.f32 0.7978846, %v231_v34  ;;  %v232_v38 = vadd.f32 %v224_v32, %v190_v12 }
  0xf9   :  { %v233_v39 = vadd.f32 %v225_v36, %v192_v24  ;;  %645 = vtanh.f32 %v239_v37  ;;  %v240_v40 = vmul.f32 0.7978846, %v232_v38 }
  0xfa   :  { %647 = vtanh.f32 %v238_v35 }
  0xfb   :  { %v241_v41 = vmul.f32 0.7978846, %v233_v39  ;;  %649 = vtanh.f32 %v240_v40 }
  0xfd   :  { %651 = vtanh.f32 %v241_v41 }
  0xff   :  { %v638_v42 = vpop.eup %637 }
 0x100   :  { %v640_v43 = vpop.eup %639  ;;  %v251_v45 = vadd.f32 1.0, %v638_v42 }
 0x101   :  { %v642_v44 = vpop.eup %641  ;;  %v250_v51 = vadd.f32 1.0, %v640_v43 }
 0x102   :  { %v252_v46 = vadd.f32 1.0, %v642_v44  ;;  %v259_v60 = vmul.f32 %v251_v45, %v195_v52 }
 0x103   :  { %v644_v48 = vpop.eup %643  ;;  %v258_v0 = vmul.f32 %v250_v51, %v194_v56 }
 0x104   :  { %v253_v55 = vadd.f32 1.0, %v644_v48  ;;  %v260_v57 = vmul.f32 %v252_v46, %v196_v49 }
 0x106   :  { %v646_v59 = vpop.eup %645  ;;  %v261_v61 = vmul.f32 %v253_v55, %v197_v53  ;;  %v298_v3 = vpack.c.bf16 %v260_v57, %v258_v0 }
 0x107   :  { %v648_v62 = vpop.eup %647  ;;  %v255_v4 = vadd.f32 1.0, %v646_v59 }
 0x108   :  { %v650_v1 = vpop.eup %649  ;;  %v299_v2 = vpack.c.bf16 %v261_v61, %v259_v60  ;;  %v254_v47 = vadd.f32 1.0, %v648_v62 }
 0x109   :  { %v256_v6 = vadd.f32 1.0, %v650_v1  ;;  %v263_v9 = vmul.f32 %v255_v4, %v199_v54  ;;  %v567_v54 = vld [vmem:[%s884_s6] ss:$0 sm:$0xff] }
 0x10a   :  { %v652_v7 = vpop.eup %651  ;;  %437 = vmatprep.mubr.bf16.mxu1 %v299_v2  ;;  %v262_v15 = vmul.f32 %v254_v47, %v198_v11 }
 0x10b   :  { %438 = vmatmul.mubr.bf16.vlgmr.msra.gmra.mxu1 %v298_v3  ;;  %v257_v58 = vadd.f32 1.0, %v652_v7  ;;  %v264_v13 = vmul.f32 %v256_v6, %v200_v8  ;;  %v566_v6 = vld [vmem:[%s883_s5] ss:$0 sm:$0xff] }
 0x10d   :  { %v265_v10 = vmul.f32 %v257_v58, %v201_v50  ;;  %v300_v16 = vpack.c.bf16 %v264_v13, %v262_v15 }
 0x10f   :  { %v301_v14 = vpack.c.bf16 %v265_v10, %v263_v9 }
 0x111   :  { %445 = vmatprep.mubr.bf16.mxu1 %v301_v14 }
 0x113   :  { %446 = vmatmul.mubr.bf16.gmra.mxu1 %v300_v16 }
 0x1cb   :  { %v584_v19 = vpop.f32.mrf.mxu1 }
 0x1cd   :  { %v585_v22 = vpop.f32.mrf.mxu1 }
 0x1ce   :  { %v586_v23 = vadd.f32 %v585_v22, %v584_v19 }
 0x1cf   :  { %v587_v24 = vpop.f32.mrf.mxu1 }
 0x1d0   :  { %v440_v12 = vadd.f32 %v586_v23, %v549_v5 }
 0x1d1   :  { %v588_v25 = vpop.f32.mrf.mxu1 }
 0x1d2   :  { %v589_v26 = vadd.f32 %v588_v25, %v587_v24  ;;  %v454_v27 = vadd.f32 %v440_v12, %v753_v17 }
 0x1d3   :  { %v590_v63 = vpop.f32.mrf.mxu1 }
 0x1d4   :  { %v443_v28 = vadd.f32 %v589_v26, %v549_v5  ;;  %460 = vadd.xlane.f32.xlu0 %v454_v27 }
 0x1d5   :  { %v591_v29 = vpop.f32.mrf.mxu1 }
 0x1d6   :  { %v592_v30 = vadd.f32 %v591_v29, %v590_v63  ;;  %v455_v31 = vadd.f32 %v443_v28, %v758_v18 }
 0x1d7   :  { %v593_v32 = vpop.f32.mrf.mxu1 }
 0x1d8   :  { %v448_v33 = vadd.f32 %v592_v30, %v549_v5  ;;  %462 = vadd.xlane.f32.xlu0 %v455_v31 }
 0x1d9   :  { %v594_v34 = vpop.f32.mrf.mxu1 }
 0x1da   :  { %v595_v35 = vadd.f32 %v594_v34, %v593_v32  ;;  %v456_v36 = vadd.f32 %v448_v33, %v765_v20 }
 0x1dc   :  { %v451_v37 = vadd.f32 %v595_v35, %v549_v5  ;;  %464 = vadd.xlane.f32.xlu1 %v456_v36 }
 0x1de   :  { %v457_v38 = vadd.f32 %v451_v37, %v770_v21 }
 0x1e0   :  { %466 = vadd.xlane.f32.xlu1 %v457_v38 }
 0x25d   :  { %v461_v17 = vpop.xlane.xlu0 %460 }
 0x25e   :  { %v469_v39 = vmul.f32 0.0078125, %v461_v17 }
 0x260   :  { %v473_v40 = vsub.f32 %v454_v27, %v469_v39 }
 0x261   :  { %v463_v41 = vpop.xlane.xlu0 %462 }
 0x262   :  { %v470_v42 = vmul.f32 0.0078125, %v463_v41  ;;  %v477_v43 = vmul.f32 %v473_v40, %v473_v40 }
 0x264   :  { %v474_v44 = vsub.f32 %v455_v31, %v470_v42  ;;  %481 = vadd.xlane.f32.xlu0 %v477_v43 }
 0x265   :  { %v465_v18 = vpop.xlane.xlu1 %464 }
 0x266   :  { %v471_v45 = vmul.f32 0.0078125, %v465_v18  ;;  %v478_v46 = vmul.f32 %v474_v44, %v474_v44 }
 0x268   :  { %v475_v48 = vsub.f32 %v456_v36, %v471_v45  ;;  %483 = vadd.xlane.f32.xlu1 %v478_v46 }
 0x269   :  { %v467_v49 = vpop.xlane.xlu1 %466 }
 0x26a   :  { %v472_v20 = vmul.f32 0.0078125, %v467_v49  ;;  %v479_v51 = vmul.f32 %v475_v48, %v475_v48 }
 0x26c   :  { %v476_v52 = vsub.f32 %v457_v38, %v472_v20  ;;  %485 = vadd.xlane.f32.xlu0 %v479_v51 }
 0x26e   :  { %v480_v21 = vmul.f32 %v476_v52, %v476_v52 }
 0x270   :  { %487 = vadd.xlane.f32.xlu1 %v480_v21 }
 0x2ed   :  { %v482_v53 = vpop.xlane.xlu0 %481 }
 0x2ee   :  { %v489_v55 = vmul.f32 0.0078125, %v482_v53 }
 0x2f0   :  { %v493_v56 = vadd.f32 1e-12, %v489_v55 }
 0x2f1   :  { %v484_v57 = vpop.xlane.xlu1 %483 }
 0x2f2   :  { %653 = vrsqrt.f32 %v493_v56  ;;  %v490_v59 = vmul.f32 0.0078125, %v484_v57 }
 0x2f4   :  { %v494_v60 = vadd.f32 1e-12, %v490_v59 }
 0x2f5   :  { %v486_v61 = vpop.xlane.xlu0 %485 }
 0x2f6   :  { %655 = vrsqrt.f32 %v494_v60  ;;  %v491_v62 = vmul.f32 0.0078125, %v486_v61 }
 0x2f8   :  { %v495_v0 = vadd.f32 1e-12, %v491_v62 }
 0x2f9   :  { %v488_v1 = vpop.xlane.xlu1 %487 }
 0x2fa   :  { %657 = vrsqrt.f32 %v495_v0  ;;  %v492_v2 = vmul.f32 0.0078125, %v488_v1 }
 0x2fc   :  { %v496_v3 = vadd.f32 1e-12, %v492_v2 }
 0x2fe   :  { %659 = vrsqrt.f32 %v496_v3 }
 0x2ff   :  { %v654_v4 = vpop.eup %653 }
 0x300   :  { %v501_v7 = vmul.f32 %v654_v4, %v473_v40 }
 0x302   :  { %v511_v50 = vmul.f32 %v566_v6, %v501_v7 }
 0x303   :  { %v656_v58 = vpop.eup %655 }
 0x304   :  { %v521_v8 = vadd.f32 %v567_v54, %v511_v50  ;;  %v502_v47 = vmul.f32 %v656_v58, %v474_v44 }
 0x306   :  { %525 = vst [vmem:[%s885_s7] sm:$0xff] %v521_v8  ;;  %v512_v9 = vmul.f32 %v566_v6, %v502_v47 }
 0x307   :  { %v658_v10 = vpop.eup %657 }
 0x308   :  { %v522_v11 = vadd.f32 %v567_v54, %v512_v9  ;;  %v503_v13 = vmul.f32 %v658_v10, %v475_v48 }
 0x30a   :  { %526 = vst [vmem:[%s885_s7 + $0x8] sm:$0xff] %v522_v11  ;;  %v513_v14 = vmul.f32 %v566_v6, %v503_v13 }
 0x30b   :  { %v660_v15 = vpop.eup %659 }
 0x30c   :  { %v523_v16 = vadd.f32 %v567_v54, %v513_v14  ;;  %v504_v19 = vmul.f32 %v660_v15, %v476_v52 }
 0x30e   :  { %527 = vst [vmem:[%s885_s7 + $0x10] sm:$0xff] %v523_v16  ;;  %v514_v5 = vmul.f32 %v566_v6, %v504_v19 }
 0x310   :  { %v524_v22 = vadd.f32 %v567_v54, %v514_v5 }
 0x312   :  { %528 = vst [vmem:[%s885_s7 + $0x18] sm:$0xff] %v524_v22 }

// kernel: _lambda_.12
= control target key start
LH: loop header
LB: loop body
LE: loop exit
PB: predicated region body
PF: predicated region fallthrough
CT: control target
= control target key end

     0   :  { %v230_v0 = vmov 0.0   ;;  %vm231_vm0 = vmmov 0   ;;  %s301_s1 = inlined_call_operand.vmem [shape: bf16[128,128], index: 1, kind: input, shape index: {}]   ;;  %s302_s0 = inlined_call_operand.vmem [shape: f32[8,128], index: 0, kind: input, shape index: {}]   ;;  %s303_s2 = inlined_call_operand.vmem [shape: f32[1,128], index: 2, kind: input, shape index: {}]   ;;  %s304_s3 = inlined_call_operand.vmem [shape: f32[1,128], index: 3, kind: input, shape index: {}]   ;;  %s305_s4 = inlined_call_operand.vmem [shape: f32[1,128], index: 4, kind: input, shape index: {}]   ;;  %s306_s5 = inlined_call_operand.vmem [shape: f32[8,128], index: 5, kind: output, shape index: {}]  }
   0x1   :  { %196 = vmatprep.subr.bf16.mxu0 %v230_v0  ;;  %v218_v1 = vld [vmem:[%s301_s1 + $0x38] sm:$0xff]   ;;  %212 = vmatprep.mubr.msk.bf16.mxu0 %vm231_vm0, %v230_v0  ;;  %v219_v2 = vld [vmem:[%s301_s1 + $0x30] sm:$0xff]   ;;  %v220_v3 = vld [vmem:[%s301_s1 + $0x28] sm:$0xff]  }
   0x2   :  { %197 = vmatpush3.bf16.msra.mxu0 %v218_v1  ;;  %v221_v4 = vld [vmem:[%s301_s1 + $0x20] sm:$0xff]   ;;  %v222_v5 = vld [vmem:[%s301_s1 + $0x18] sm:$0xff]   ;;  %v223_v6 = vld [vmem:[%s301_s1 + $0x10] sm:$0xff]  }
   0x3   :  { %198 = vmatprep.subr.bf16.mxu0 %v230_v0  ;;  %v224_v7 = vld [vmem:[%s301_s1 + $0x8] sm:$0xff]   ;;  %v225_v8 = vld [vmem:[%s301_s1] sm:$0xff]  }
   0x4   :  { %v21_v9 = vld [vmem:[%s302_s0] sm:$0xff] }
   0x5   :  { %v38_v10 = vpack.c.bf16 %v21_v9, %v21_v9  ;;  %v176_v11 = vld [vmem:[%s303_s2] ss:$0 sm:$0xff] }
   0x6   :  { %199 = vmatpush3.bf16.msra.mxu0 %v219_v2  ;;  %v185_v34 = vld [vmem:[%s304_s3] ss:$0 sm:$0xff] }
   0x7   :  { %200 = vmatprep.subr.bf16.mxu0 %v230_v0  ;;  %v186_v36 = vld [vmem:[%s305_s4] ss:$0 sm:$0xff] }
   0xa   :  { %201 = vmatpush3.bf16.msra.mxu0 %v220_v3 }
   0xb   :  { %202 = vmatprep.subr.bf16.mxu0 %v230_v0 }
   0xe   :  { %203 = vmatpush3.bf16.msra.mxu0 %v221_v4 }
   0xf   :  { %204 = vmatprep.subr.bf16.mxu0 %v230_v0 }
  0x12   :  { %205 = vmatpush3.bf16.msra.mxu0 %v222_v5 }
  0x13   :  { %206 = vmatprep.subr.bf16.mxu0 %v230_v0 }
  0x16   :  { %207 = vmatpush3.bf16.msra.mxu0 %v223_v6 }
  0x17   :  { %208 = vmatprep.subr.bf16.mxu0 %v230_v0 }
  0x1a   :  { %209 = vmatpush3.bf16.msra.mxu0 %v224_v7 }
  0x1b   :  { %210 = vmatprep.subr.bf16.mxu0 %v230_v0 }
  0x1e   :  { %211 = vmatpush3.bf16.msra.mxu0 %v225_v8 }
  0x21   :  { %213 = vmatmul.mubr.bf16.vlgmr.msra.gmra.mxu0 %v38_v10 }
  0xe1   :  { %v128_v12 = vpop.f32.mrf.mxu0 }
  0xe2   :  { %v129_v13 = vadd.f32 %v176_v11, %v128_v12 }
  0xe3   :  { %v214_v14 = vpop.f32.mrf.mxu0 }
  0xe4   :  { %v135_v15 = vmul.f32 0.044715, %v129_v13  ;;  %v134_v23 = vmul.f32 0.5, %v129_v13 }
  0xe5   :  { %v131_v16 = vpop.f32.mrf.mxu0 }
  0xe6   :  { %v136_v17 = vmul.f32 %v135_v15, %v129_v13 }
  0xe7   :  { %v215_v18 = vpop.f32.mrf.mxu0 }
  0xe8   :  { %v137_v19 = vmul.f32 %v136_v17, %v129_v13 }
  0xea   :  { %v138_v20 = vadd.f32 %v137_v19, %v129_v13 }
  0xec   :  { %v139_v21 = vmul.f32 0.7978846, %v138_v20 }
  0xee   :  { %226 = vtanh.f32 %v139_v21 }
  0xfb   :  { %v227_v22 = vpop.eup %226 }
  0xfc   :  { %v141_v24 = vadd.f32 1.0, %v227_v22 }
  0xfe   :  { %v142_v25 = vmul.f32 %v141_v24, %v134_v23 }
 0x100   :  { %145 = vadd.xlane.f32.xlu0 %v142_v25 }
 0x189   :  { %v146_v26 = vpop.xlane.xlu0 %145 }
 0x18a   :  { %v148_v27 = vmul.f32 0.0078125, %v146_v26 }
 0x18c   :  { %v149_v28 = vsub.f32 %v142_v25, %v148_v27 }
 0x18e   :  { %v150_v29 = vmul.f32 %v149_v28, %v149_v28 }
 0x190   :  { %151 = vadd.xlane.f32.xlu0 %v150_v29 }
 0x219   :  { %v152_v30 = vpop.xlane.xlu0 %151 }
 0x21a   :  { %v153_v31 = vmul.f32 0.0078125, %v152_v30 }
 0x21c   :  { %v154_v32 = vadd.f32 1e-12, %v153_v31 }
 0x21e   :  { %228 = vrsqrt.f32 %v154_v32 }
 0x22b   :  { %v229_v33 = vpop.eup %228 }
 0x22c   :  { %v156_v35 = vmul.f32 %v229_v33, %v149_v28 }
 0x22e   :  { %v163_v37 = vmul.f32 %v185_v34, %v156_v35 }
 0x230   :  { %v170_v38 = vadd.f32 %v186_v36, %v163_v37 }
 0x232   :  { %171 = vst [vmem:[%s306_s5] sm:$0xff] %v170_v38 }

// kernel: _lambda_.8
= control target key start
LH: loop header
LB: loop body
LE: loop exit
PB: predicated region body
PF: predicated region fallthrough
CT: control target
= control target key end

     0   :  { %s2846_s27 = smov 0   ;;  %s3326_s0 = inlined_call_operand.vmem [shape: f32[2,16,128], index: 0, kind: input, shape index: {}]   ;;  %s3327_s1 = inlined_call_operand.vmem [shape: f32[2,1,16], index: 1, kind: input, shape index: {}]   ;;  %s3328_s2 = inlined_call_operand.vmem [shape: bf16[128,384], index: 2, kind: input, shape index: {}]   ;;  %s3329_s3 = inlined_call_operand.vmem [shape: f32[1,384], index: 3, kind: input, shape index: {}]   ;;  %s3330_s4 = inlined_call_operand.vmem [shape: bf16[128,128], index: 4, kind: input, shape index: {}]   ;;  %s3331_s5 = inlined_call_operand.vmem [shape: f32[1,128], index: 5, kind: input, shape index: {}]   ;;  %s3332_s6 = inlined_call_operand.vmem [shape: f32[1,128], index: 6, kind: input, shape index: {}]   ;;  %s3333_s7 = inlined_call_operand.vmem [shape: f32[1,128], index: 7, kind: input, shape index: {}]   ;;  %s3334_s8 = inlined_call_operand.vmem [shape: f32[2,16,128], index: 8, kind: output, shape index: {}]  }
   0x1 LB: > { %s2482_s28 = sadd.s32 4294967295, %s2791_s27   ;;  %p2486_p0 = scmp.ge.s32.totalorder %s2791_s27, 1  ;;  %s2791_s27 = sphi %s2846_s27, %s18_s27  }
   0x2   : > { %p270_p1 = scmp.lt.s32.totalorder %s2791_s27, 3 }
   0x4   : > { %p271_p2 = pnand %p2486_p0, %p270_p1 }
   0x5   : > { %p307_p3 = scmp.lt.s32.totalorder (!%p271_p2), %s2482_s28, 1  ;;  %s2795_s16 = smov (!%p271_p2), 96  }
   0x6   : > { %274 = sbr.rel (%p271_p2) target bundleno = 1828 (0x724), region = 52  ;;  %s2796_s17 = smov (!%p271_p2), 64  }
   0x7   : > { %s2797_s21 = smov (!%p271_p2), 32  }
   0xb   : > { %v2707_v0 = vld [vmem:[%s3328_s2 + $0xac] ss:$12 sps:$4 sm:$0xff]   ;;  %v2709_v1 = vld [vmem:[%s3328_s2 + $0xa8] ss:$12 sps:$4 sm:$0xff]   ;;  %v2793_v2 = vmov 0   ;;  %s3336_s28 = smov (!%p307_p3, %s2482_s28), 1  ;;  %v361_v22 = vlaneseq }
   0xc   : > { %536 = vmatprep.mubr.bf16.mxu0 %v2793_v2  ;;  %504 = vmatprep.subr.bf16.mxu0 %v2707_v0  ;;  %v2710_v3 = vld [vmem:[%s3328_s2 + $0x94] ss:$12 sps:$4 sm:$0xff]   ;;  %v2712_v4 = vld [vmem:[%s3328_s2 + $0x90] ss:$12 sps:$4 sm:$0xff]   ;;  %v2715_v6 = vld [vmem:[%s3328_s2 + $0x78] ss:$12 sps:$4 sm:$0xff]   ;;  %s314_s9 = scalar_lea.vmem %s3327_s1, %s3336_s28 }
   0xd   : > { %505 = vmatpush1.bf16.msra.mxu0 %v2709_v1  ;;  %v2713_v5 = vld [vmem:[%s3328_s2 + $0x7c] ss:$12 sps:$4 sm:$0xff]   ;;  %v2716_v7 = vld [vmem:[%s3328_s2 + $0x64] ss:$12 sps:$4 sm:$0xff]   ;;  %v2718_v8 = vld [vmem:[%s3328_s2 + $0x60] ss:$12 sps:$4 sm:$0xff]  }
   0xe   : > { %506 = vmatprep.subr.bf16.mxu0 %v2710_v3  ;;  %s2552_s23 = sshll.u32 %s3336_s28, 4  ;;  %v2719_v9 = vld [vmem:[%s3328_s2 + $0x4c] ss:$12 sps:$4 sm:$0xff]   ;;  %v2721_v10 = vld [vmem:[%s3328_s2 + $0x48] ss:$12 sps:$4 sm:$0xff]   ;;  %v2794_v21 = vmov 0.0  }
   0xf   : > { %v2722_v11 = vld [vmem:[%s3328_s2 + $0x34] ss:$12 sps:$4 sm:$0xff]   ;;  %v2724_v12 = vld [vmem:[%s3328_s2 + $0x30] ss:$12 sps:$4 sm:$0xff]   ;;  %v2727_v14 = vld [vmem:[%s3328_s2 + $0x18] ss:$12 sps:$4 sm:$0xff]   ;;  %s2907_s20 = scalar_lea.vmem %s3326_s0, %s2552_s23  ;;  %2588 = vmatprep.subr.bf16.mxu1 %v2794_v21  ;;  %s319_s15 = scalar_lea.vmem %s3334_s8, %s2552_s23 }
  0x10   : > { %v2725_v13 = vld [vmem:[%s3328_s2 + $0x1c] ss:$12 sps:$4 sm:$0xff]   ;;  %v2728_v15 = vld [vmem:[%s3328_s2 + $0x4] ss:$12 sps:$4 sm:$0xff]   ;;  %v2730_v16 = vld [vmem:[%s3328_s2] ss:$12 sps:$4 sm:$0xff]  }
  0x11   : > { %507 = vmatpush1.bf16.msra.mxu0 %v2712_v4  ;;  %v321_v17 = vld [vmem:[%s2907_s20] sm:$0xff]  ;;  %v322_v18 = vld [vmem:[%s2907_s20 + $0x8] sm:$0xff]  ;;  %v2731_v20 = vld [vmem:[%s3328_s2 + $0xb0] ss:$12 sps:$4 sm:$0xff]   ;;  %v2920_v23 = vshrl.u32 %v361_v22, 7  ;;  %vm2798_vm0 = vmmov 0  }
  0x12   : > { %508 = vmatprep.subr.bf16.mxu0 %v2713_v5  ;;  %v358_v19 = vpack.c.bf16 %v322_v18, %v321_v17  ;;  %2589 = vmatpush3.bf16.msra.mxu1 %v2731_v20  ;;  %v2732_v24 = vld [vmem:[%s3328_s2 + $0x98] ss:$12 sps:$4 sm:$0xff]   ;;  %v2733_v26 = vld [vmem:[%s3328_s2 + $0x80] ss:$12 sps:$4 sm:$0xff]   ;;  %v2734_v30 = vld [vmem:[%s3328_s2 + $0x68] ss:$12 sps:$4 sm:$0xff]  }
  0x13   : > { %2590 = vmatprep.subr.bf16.mxu1 %v2794_v21  ;;  %v363_v25 = vsub.s32 0, %v2920_v23  ;;  %v2933_v27 = vld [vmem:[%s3329_s3] sm:$0x7]  ;;  %v367_v28 = vsub.s32 1, %v2920_v23  ;;  %v2735_v35 = vld [vmem:[%s3328_s2 + $0x50] ss:$12 sps:$4 sm:$0xff]   ;;  %2604 = vmatprep.mubr.msk.bf16.mxu1 %vm2798_vm0, %v2794_v21 }
  0x14   : > { %v2736_v39 = vld [vmem:[%s3328_s2 + $0x38] ss:$12 sps:$4 sm:$0xff]   ;;  %v2737_v42 = vld [vmem:[%s3328_s2 + $0x20] ss:$12 sps:$4 sm:$0xff]   ;;  %v2738_v43 = vld [vmem:[%s3328_s2 + $0x8] ss:$12 sps:$4 sm:$0xff]  }
  0x15   : > { %509 = vmatpush1.bf16.msra.mxu0 %v2715_v6  ;;  %v364_v29 = vrot.slane %v2933_v27, %v363_v25  ;;  %v368_v31 = vrot.slane %v2933_v27, %v367_v28  ;;  %v2799_v44 = vmov 1983009808   ;;  %v2800_v47 = vmov 1934713408  }
  0x16   : > { %510 = vmatprep.subr.bf16.mxu0 %v2716_v7  ;;  %2591 = vmatpush3.bf16.msra.mxu1 %v2732_v24  ;;  %v611_v45 = vunpack.c.l.s4 %v2799_v44  ;;  %v643_v48 = vunpack.c.l.s4 %v2800_v47  ;;  %vm1476_vm1 = vcmask 261120   ;;  %vm1687_vm2 = vcmask 130048  }
  0x17   : > { %2592 = vmatprep.subr.bf16.mxu1 %v2794_v21  ;;  %vm2254_vm3 = vcmask 523264   ;;  %vm2257_vm4 = vcmask 785408  }
  0x18   : > { %v612_v50 = vunpack.c.0.s8 %v611_v45  ;;  %v644_v52 = vunpack.c.0.s8 %v643_v48 }
  0x19   : > { %511 = vmatpush1.bf16.msra.mxu0 %v2718_v8 }
  0x1a   : > { %512 = vmatprep.subr.bf16.mxu0 %v2719_v9  ;;  %2593 = vmatpush3.bf16.msra.mxu1 %v2733_v26  ;;  %v2999_v54 = vsub.s32 %v612_v50, %v2920_v23  ;;  %v3002_v60 = vsub.s32 %v644_v52, %v2920_v23 }
  0x1b   : > { %2594 = vmatprep.subr.bf16.mxu1 %v2794_v21 }
  0x1d   : > { %513 = vmatpush1.bf16.msra.mxu0 %v2721_v10 }
  0x1e   : > { %514 = vmatprep.subr.bf16.mxu0 %v2722_v11  ;;  %2595 = vmatpush3.bf16.msra.mxu1 %v2734_v30 }
  0x1f   : > { %2596 = vmatprep.subr.bf16.mxu1 %v2794_v21 }
  0x21   : > { %515 = vmatpush1.bf16.msra.mxu0 %v2724_v12 }
  0x22   : > { %516 = vmatprep.subr.bf16.mxu0 %v2725_v13  ;;  %2597 = vmatpush3.bf16.msra.mxu1 %v2735_v35 }
  0x23   : > { %2598 = vmatprep.subr.bf16.mxu1 %v2794_v21 }
  0x25   : > { %517 = vmatpush1.bf16.msra.mxu0 %v2727_v14 }
  0x26   : > { %518 = vmatprep.subr.bf16.mxu0 %v2728_v15  ;;  %2599 = vmatpush3.bf16.msra.mxu1 %v2736_v39 }
  0x27   : > { %2600 = vmatprep.subr.bf16.mxu1 %v2794_v21 }
  0x29   : > { %519 = vmatpush1.bf16.msra.mxu0 %v2730_v16 }
  0x2a   : > { %2632 = vmatprep.subr.bf16.mxu0 %v2794_v21  ;;  %2601 = vmatpush3.bf16.msra.mxu1 %v2737_v42 }
  0x2b   : > { %2602 = vmatprep.subr.bf16.mxu1 %v2794_v21 }
  0x2c   : > { %537 = vmatmul.mubr.bf16.vlgmr.msra.gmra.mxu0 %v358_v19 }
  0x2d   : > { %2634 = vmatprep.mubr.msk.bf16.mxu0 %vm2798_vm0, %v2794_v21 }
  0x2e   : > { %2603 = vmatpush3.bf16.msra.mxu1 %v2738_v43 }
  0x2f   : > { %2608 = vmatprep.subr.bf16.mxu1 %v2794_v21 }
  0x31   : > { %2605 = vmatmul.mubr.bf16.vlgmr.msra.gmra.mxu1 %v358_v19 }
  0x32   : > { %2610 = vmatprep.mubr.msk.bf16.mxu1 %vm2798_vm0, %v2794_v21 }
  0xec   : > { %v538_v32 = vpop.f32.mrf.mxu0 }
  0xed   : > { %v2944_v33 = vadd.f32 %v538_v32, %v364_v29 }
  0xee   : > { %v540_v34 = vpop.f32.mrf.mxu0 }
  0xef   : > { %v541_v36 = vadd.f32 %v540_v34, %v368_v31  ;;  %590 = vrot.lane.b32.xlu0 %v2944_v33, %s2795_s16 }
  0xf0   : > { %v542_v37 = vpop.f32.mrf.mxu0 }
  0xf1   : > { %892 = vrot.lane.b32.xlu1 %v541_v36, %s2796_s17  ;;  %v2954_v38 = vadd.f32 %v542_v37, %v364_v29 }
  0xf2   : > { %v544_v40 = vpop.f32.mrf.mxu0 }
  0xf3   : > { %886 = vrot.lane.b32.xlu0 %v541_v36, %s2795_s16  ;;  %v2963_v41 = vadd.f32 %v544_v40, %v368_v31 }
  0xf5   : > { %592 = vrot.lane.b32.xlu1 %v2954_v38, %s2795_s16 }
  0xf7   : > { %898 = vrot.lane.b32.xlu0 %v541_v36, %s2797_s21 }
  0xf9   : > { %894 = vrot.lane.b32.xlu1 %v2963_v41, %s2796_s17 }
  0xfb   : > { %888 = vrot.lane.b32.xlu0 %v2963_v41, %s2795_s16 }
  0xfd   : > { %900 = vrot.lane.b32.xlu1 %v2963_v41, %s2797_s21 }
  0xff   : > { %596 = vrot.lane.b32.xlu0 %v2944_v33, %s2796_s17 }
 0x101   : > { %598 = vrot.lane.b32.xlu1 %v2954_v38, %s2796_s17 }
 0x103   : > { %602 = vrot.lane.b32.xlu0 %v2944_v33, %s2797_s21 }
 0x105   : > { %604 = vrot.lane.b32.xlu1 %v2954_v38, %s2797_s21 }
 0x161   : > { %v2994_v46 = vpop.permute.xlu0 %590 }
 0x163   : > { %v893_v49 = vpop.permute.xlu1 %892 }
 0x164   : > { %v904_v55 = vcombine.low %v541_v36, %v893_v49  ;;  %v905_v56 = vcombine.high %v541_v36, %v893_v49 }
 0x165   : > { %v887_v51 = vpop.permute.xlu0 %886 }
 0x166   : > { %v912_v62 = vrot.slane %v904_v55, %v2999_v54  ;;  %v919_v63 = vrot.slane %v905_v56, %v2999_v54 }
 0x167   : > { %v2996_v53 = vpop.permute.xlu1 %592 }
 0x169   : > { %v899_v57 = vpop.permute.xlu0 %898 }
 0x16a   : > { %v920_v58 = vcombine.low %v887_v51, %v899_v57  ;;  %v921_v59 = vcombine.high %v887_v51, %v899_v57 }
 0x16b   : > { %v895_v61 = vpop.permute.xlu1 %894 }
 0x16c   : > { %v928_v0 = vrot.slane %v920_v58, %v2999_v54  ;;  %v935_v1 = vrot.slane %v921_v59, %v2999_v54  ;;  %v972_v7 = vcombine.low %v2963_v41, %v895_v61  ;;  %v973_v8 = vcombine.high %v2963_v41, %v895_v61 }
 0x16d   : > { %v889_v2 = vpop.permute.xlu0 %888 }
 0x16e   : > { %v936_v3 = vcombine.low %v912_v62, %v928_v0  ;;  %v937_v4 = vcombine.high %v912_v62, %v928_v0  ;;  %v952_v5 = vcombine.low %v919_v63, %v935_v1  ;;  %v953_v6 = vcombine.high %v919_v63, %v935_v1 }
 0x16f   : > { %v901_v9 = vpop.permute.xlu1 %900  ;;  %v980_v19 = vrot.slane %v972_v7, %v2999_v54  ;;  %v987_v29 = vrot.slane %v973_v8, %v2999_v54 }
 0x170   : > { %v944_v10 = vrot.slane %v936_v3, %v3002_v60  ;;  %v951_v11 = vrot.slane %v937_v4, %v3002_v60  ;;  %v960_v12 = vrot.slane %v952_v5, %v3002_v60  ;;  %v967_v13 = vrot.slane %v953_v6, %v3002_v60 }
 0x171   : > { %v988_v14 = vcombine.low %v889_v2, %v901_v9  ;;  %v989_v15 = vcombine.high %v889_v2, %v901_v9  ;;  %v597_v16 = vpop.permute.xlu0 %596 }
 0x172   : > { %v1040_v17 = vcombine.low %v944_v10, %v951_v11  ;;  %v2519_v18 = vcombine.high %v944_v10, %v951_v11  ;;  %v1056_v26 = vcombine.low %v960_v12, %v967_v13  ;;  %v2520_v28 = vcombine.high %v960_v12, %v967_v13 }
 0x173   : > { %v996_v20 = vrot.slane %v988_v14, %v2999_v54  ;;  %v1003_v22 = vrot.slane %v989_v15, %v2999_v54  ;;  %v599_v24 = vpop.permute.xlu1 %598  ;;  %v608_v32 = vcombine.low %v2944_v33, %v597_v16  ;;  %v609_v34 = vcombine.high %v2944_v33, %v597_v16 }
 0x174   : > { %v3021_v36 = vrot.slane %v1040_v17, %v2999_v54  ;;  %v3024_v37 = vrot.slane %v2519_v18, %v2999_v54  ;;  %v3029_v44 = vrot.slane %v1056_v26, %v2999_v54  ;;  %v3032_v45 = vrot.slane %v2520_v28, %v2999_v54 }
 0x175   : > { %v1004_v30 = vcombine.low %v980_v19, %v996_v20  ;;  %v1005_v31 = vcombine.high %v980_v19, %v996_v20  ;;  %v603_v35 = vpop.permute.xlu0 %602  ;;  %v1020_v41 = vcombine.low %v987_v29, %v1003_v22  ;;  %v1021_v42 = vcombine.high %v987_v29, %v1003_v22 }
 0x176   : > { %v624_v33 = vcombine.low %v2994_v46, %v603_v35  ;;  %v625_v47 = vcombine.high %v2994_v46, %v603_v35  ;;  %v616_v48 = vrot.slane %v608_v32, %v2999_v54  ;;  %v623_v49 = vrot.slane %v609_v34, %v2999_v54 }
 0x177   : > { %v1012_v39 = vrot.slane %v1004_v30, %v3002_v60  ;;  %v1019_v40 = vrot.slane %v1005_v31, %v3002_v60  ;;  %v605_v43 = vpop.permute.xlu1 %604  ;;  %v676_v50 = vcombine.low %v2954_v38, %v599_v24  ;;  %v677_v51 = vcombine.high %v2954_v38, %v599_v24 }
 0x178   : > { %v632_v52 = vrot.slane %v624_v33, %v2999_v54  ;;  %v639_v55 = vrot.slane %v625_v47, %v2999_v54  ;;  %v692_v56 = vcombine.low %v2996_v53, %v605_v43  ;;  %v693_v57 = vcombine.high %v2996_v53, %v605_v43 }
 0x179   : > { %v1028_v58 = vrot.slane %v1020_v41, %v3002_v60  ;;  %v1035_v46 = vrot.slane %v1021_v42, %v3002_v60  ;;  %v1108_v59 = vcombine.low %v1012_v39, %v1019_v40  ;;  %v2521_v61 = vcombine.high %v1012_v39, %v1019_v40 }
 0x17a   : > { %v640_v62 = vcombine.low %v616_v48, %v632_v52  ;;  %v641_v63 = vcombine.high %v616_v48, %v632_v52  ;;  %v656_v0 = vcombine.low %v623_v49, %v639_v55  ;;  %v657_v1 = vcombine.high %v623_v49, %v639_v55 }
 0x17b   : > { %v684_v38 = vrot.slane %v676_v50, %v2999_v54  ;;  %v691_v2 = vrot.slane %v677_v51, %v2999_v54  ;;  %v700_v3 = vrot.slane %v692_v56, %v2999_v54  ;;  %v707_v4 = vrot.slane %v693_v57, %v2999_v54 }
 0x17c   : > { %v648_v53 = vrot.slane %v640_v62, %v3002_v60  ;;  %v655_v5 = vrot.slane %v641_v63, %v3002_v60  ;;  %v664_v6 = vrot.slane %v656_v0, %v3002_v60  ;;  %v671_v7 = vrot.slane %v657_v1, %v3002_v60 }
 0x17d   : > { %v708_v8 = vcombine.low %v684_v38, %v700_v3  ;;  %v709_v9 = vcombine.high %v684_v38, %v700_v3  ;;  %v724_v10 = vcombine.low %v691_v2, %v707_v4  ;;  %v725_v11 = vcombine.high %v691_v2, %v707_v4 }
 0x17e   : > { %v1115_v12 = vrot.slane %v1108_v59, %v2999_v54  ;;  %v1123_v13 = vrot.slane %v2521_v61, %v2999_v54  ;;  %v1124_v14 = vcombine.low %v1028_v58, %v1035_v46  ;;  %v2522_v15 = vcombine.high %v1028_v58, %v1035_v46 }
 0x17f   : > { %v716_v16 = vrot.slane %v708_v8, %v3002_v60  ;;  %v723_v17 = vrot.slane %v709_v9, %v3002_v60  ;;  %v732_v18 = vrot.slane %v724_v10, %v3002_v60  ;;  %v739_v19 = vrot.slane %v725_v11, %v3002_v60 }
 0x180   : > { %v744_v20 = vcombine.low %v648_v53, %v655_v5  ;;  %v2515_v22 = vcombine.high %v648_v53, %v655_v5  ;;  %v760_v24 = vcombine.low %v664_v6, %v671_v7  ;;  %v2516_v26 = vcombine.high %v664_v6, %v671_v7 }
 0x181   : > { %v812_v28 = vcombine.low %v716_v16, %v723_v17  ;;  %v2517_v29 = vcombine.high %v716_v16, %v723_v17  ;;  %v828_v30 = vcombine.low %v732_v18, %v739_v19  ;;  %v2518_v31 = vcombine.high %v732_v18, %v739_v19 }
 0x182   : > { %v1131_v32 = vrot.slane %v1124_v14, %v2999_v54  ;;  %v1139_v34 = vrot.slane %v2522_v15, %v2999_v54  ;;  %v1072_v35 = vcombine.low %v3021_v36, %v3024_v37  ;;  %v1088_v39 = vcombine.low %v3029_v44, %v3032_v45 }
 0x183   : > { %v819_v40 = vrot.slane %v812_v28, %v2999_v54  ;;  %v827_v41 = vrot.slane %v2517_v29, %v2999_v54  ;;  %v835_v42 = vrot.slane %v828_v30, %v2999_v54  ;;  %v843_v43 = vrot.slane %v2518_v31, %v2999_v54 }
 0x184   : > { %v751_v33 = vrot.slane %v744_v20, %v2999_v54  ;;  %v759_v47 = vrot.slane %v2515_v22, %v2999_v54  ;;  %v767_v48 = vrot.slane %v760_v24, %v2999_v54  ;;  %v775_v49 = vrot.slane %v2516_v26, %v2999_v54 }
 0x185   : > { %v844_v50 = vcombine.low %v819_v40, %v827_v41  ;;  %v860_v51 = vcombine.low %v835_v42, %v843_v43  ;;  %v1080_v52 = vrot.slane %v1072_v35, %v3002_v60  ;;  %v1096_v55 = vrot.slane %v1088_v39, %v3002_v60 }
 0x186   : > { %v1140_v56 = vcombine.low %v1115_v12, %v1123_v13  ;;  %v1156_v57 = vcombine.low %v1131_v32, %v1139_v34  ;;  %v776_v58 = vcombine.low %v751_v33, %v759_v47  ;;  %v792_v46 = vcombine.low %v767_v48, %v775_v49 }
 0x187   : > { %v852_v62 = vrot.slane %v844_v50, %v3002_v60  ;;  %v868_v63 = vrot.slane %v860_v51, %v3002_v60  ;;  %v1104_v0 = vcombine.low %v1080_v52, %v1096_v55  ;;  %v1141_v6 = vcombine.high %v1115_v12, %v1123_v13  ;;  %v581_v50 = vpop.f32.mrf.mxu1 }
 0x188   : > { %v1148_v59 = vrot.slane %v1140_v56, %v3002_v60  ;;  %v1164_v61 = vrot.slane %v1156_v57, %v3002_v60  ;;  %v784_v38 = vrot.slane %v776_v58, %v3002_v60  ;;  %v800_v2 = vrot.slane %v792_v46, %v3002_v60  ;;  %v323_v56 = vld [vmem:[%s314_s9] sm:$0x1] }
 0x189   : > { %v876_v4 = vcombine.low %v852_v62, %v868_v63  ;;  %v1157_v7 = vcombine.high %v1131_v32, %v1139_v34  ;;  %v1105_v9 = vcombine.high %v1080_v52, %v1096_v55  ;;  %v1073_v10 = vcombine.high %v3021_v36, %v3024_v37  ;;  %v2606_v51 = vpop.f32.mrf.mxu1 }
 0x18a   : > { %v1172_v1 = vcombine.low %v1148_v59, %v1164_v61  ;;  %v1173_v5 = vcombine.high %v1148_v59, %v1164_v61  ;;  %v808_v8 = vcombine.low %v784_v38, %v800_v2  ;;  %v1089_v11 = vcombine.high %v3029_v44, %v3032_v45 }
 0x18b   : > { %v1155_v16 = vrot.slane %v1141_v6, %v3002_v60  ;;  %v1171_v17 = vrot.slane %v1157_v7, %v3002_v60  ;;  %v1087_v12 = vrot.slane %v1073_v10, %v3002_v60  ;;  %v845_v36 = vcombine.high %v819_v40, %v827_v41  ;;  %v584_v52 = vpop.f32.mrf.mxu1 }
 0x18c   : > { %v1176_v3 = vpack.c.bf16 %v1172_v1, %v1104_v0  ;;  %v880_v14 = vpack.c.bf16 %v876_v4, %v808_v8  ;;  %v1177_v15 = vpack.c.bf16 %v1173_v5, %v1105_v9  ;;  %v1103_v13 = vrot.slane %v1089_v11, %v3002_v60 }
 0x18d   : > { %v1174_v19 = vcombine.low %v1155_v16, %v1171_v17  ;;  %v861_v37 = vcombine.high %v835_v42, %v843_v43  ;;  %v877_v44 = vcombine.high %v852_v62, %v868_v63  ;;  %v777_v20 = vcombine.high %v751_v33, %v759_v47  ;;  %v2607_v55 = vpop.f32.mrf.mxu1 }
 0x18e   : > { %v1481_v53 = vsel %vm1476_vm1, %v1176_v3, 0  ;;  %v1528_v18 = vsel %vm1476_vm1, %v1177_v15, 0  ;;  %v1106_v45 = vcombine.low %v1087_v12, %v1103_v13  ;;  %v793_v22 = vcombine.high %v767_v48, %v775_v49 }
 0x18f   : > { %2609 = vmatpush3.bf16.xpose.msra.mxu1 %v1481_v53  ;;  %v809_v24 = vcombine.high %v784_v38, %v800_v2  ;;  %v859_v28 = vrot.slane %v845_v36, %v3002_v60  ;;  %v875_v29 = vrot.slane %v861_v37, %v3002_v60  ;;  %v791_v31 = vrot.slane %v777_v20, %v3002_v60 }
 0x190   : > { %2614 = vmatprep.subr.bf16.mxu1 %v2794_v21  ;;  %v1178_v26 = vpack.c.bf16 %v1174_v19, %v1106_v45  ;;  %v807_v32 = vrot.slane %v793_v22, %v3002_v60  ;;  %v1175_v35 = vcombine.high %v1155_v16, %v1171_v17  ;;  %v1107_v40 = vcombine.high %v1087_v12, %v1103_v13 }
 0x191   : > { %v881_v30 = vpack.c.bf16 %v877_v44, %v809_v24  ;;  %v878_v39 = vcombine.low %v859_v28, %v875_v29  ;;  %v879_v47 = vcombine.high %v859_v28, %v875_v29  ;;  %v324_v57 = vsub.f32 1.0, %v323_v56 }
 0x192   : > { %v1575_v34 = vsel %vm1476_vm1, %v1178_v26, 0  ;;  %v810_v41 = vcombine.low %v791_v31, %v807_v32  ;;  %v1179_v42 = vpack.c.bf16 %v1175_v35, %v1107_v40  ;;  %v811_v48 = vcombine.high %v791_v31, %v807_v32 }
 0x193   : > { %v325_v58 = vmul.f32 -10000.0, %v324_v57 }
 0x194   : > { %v882_v43 = vpack.c.bf16 %v878_v39, %v810_v41  ;;  %v1622_v33 = vsel %vm1476_vm1, %v1179_v42, 0  ;;  %v883_v49 = vpack.c.bf16 %v879_v47, %v811_v48 }
 0x195   : > { %v1677_v46 = vrot.slane %v325_v58, %v363_v25 }
 0x196   : > { %2611 = vmatmul.mubr.msk.bf16.vlgmr.msra.gmra.mxu1 %vm1476_vm1, %v880_v14 }
 0x197   : > { %2615 = vmatpush3.bf16.xpose.msra.mxu1 %v1528_v18  ;;  %2616 = vmatprep.mubr.msk.bf16.mxu1 %vm2798_vm0, %v2794_v21 }
 0x198   : > { %2620 = vmatprep.subr.bf16.mxu1 %v2794_v21 }
 0x19e   : > { %2617 = vmatmul.mubr.msk.bf16.vlgmr.msra.gmra.mxu1 %vm1476_vm1, %v881_v30 }
 0x19f   : > { %2621 = vmatpush3.bf16.xpose.msra.mxu1 %v1575_v34  ;;  %2622 = vmatprep.mubr.msk.bf16.mxu1 %vm2798_vm0, %v2794_v21  ;;  %v371_v34 = vsub.s32 2, %v2920_v23 }
 0x1a0   : > { %2626 = vmatprep.subr.bf16.mxu1 %v2794_v21 }
 0x1a1   : > { %v372_v35 = vrot.slane %v2933_v27, %v371_v34 }
 0x1a3   : > { %v3133_v39 = vadd.f32 %v581_v50, %v372_v35  ;;  %v3139_v40 = vadd.f32 %v584_v52, %v372_v35 }
 0x1a6   : > { %2623 = vmatmul.mubr.msk.bf16.vlgmr.msra.gmra.mxu1 %vm1476_vm1, %v882_v43 }
 0x1a7   : > { %2627 = vmatpush3.bf16.xpose.msra.mxu1 %v1622_v33  ;;  %2628 = vmatprep.mubr.msk.bf16.mxu1 %vm2798_vm0, %v2794_v21 }
 0x1a8   : > { %2638 = vmatprep.subr.bf16.mxu1 %v2794_v21 }
 0x1ae   : > { %2629 = vmatmul.mubr.msk.bf16.vlgmr.msra.gmra.mxu1 %vm1476_vm1, %v883_v49 }
 0x1af   : > { %2640 = vmatprep.mubr.msk.bf16.mxu1 %vm2798_vm0, %v2794_v21 }
 0x256   : > { %v1517_v59 = vpop.f32.mrf.mxu1 }
 0x257   : > { %v1665_v61 = vmul.f32 0.17677669, %v1517_v59 }
 0x258   : > { %v2612_v62 = vpop.f32.mrf.mxu1 }
 0x259   : > { %v1679_v63 = vadd.f32 %v1677_v46, %v1665_v61 }
 0x25a   : > { %v1520_v0 = vpop.f32.mrf.mxu1 }
 0x25b   : > { %v1666_v1 = vmul.f32 0.17677669, %v1520_v0  ;;  %v1688_v38 = vsel %vm1687_vm2, %v1679_v63, -inf }
 0x25c   : > { %1689 = vmax.xlane.f32.xlu0 %v1688_v38  ;;  %v2613_v2 = vpop.f32.mrf.mxu1 }
 0x25d   : > { %v1680_v3 = vadd.f32 %v1677_v46, %v1666_v1 }
 0x25e   : > { %v1564_v4 = vpop.f32.mrf.mxu1 }
 0x25f   : > { %v1667_v53 = vmul.f32 0.17677669, %v1564_v4  ;;  %v1691_v5 = vsel %vm1687_vm2, %v1680_v3, -inf }
 0x260   : > { %1692 = vmax.xlane.f32.xlu1 %v1691_v5  ;;  %v2618_v6 = vpop.f32.mrf.mxu1 }
 0x261   : > { %v1681_v7 = vadd.f32 %v1677_v46, %v1667_v53 }
 0x262   : > { %v1567_v25 = vpop.f32.mrf.mxu1 }
 0x263   : > { %v1668_v8 = vmul.f32 0.17677669, %v1567_v25  ;;  %v1694_v9 = vsel %vm1687_vm2, %v1681_v7, -inf }
 0x264   : > { %1695 = vmax.xlane.f32.xlu0 %v1694_v9  ;;  %v2619_v10 = vpop.f32.mrf.mxu1 }
 0x265   : > { %v1682_v11 = vadd.f32 %v1677_v46, %v1668_v8 }
 0x266   : > { %v1611_v14 = vpop.f32.mrf.mxu1 }
 0x267   : > { %v1669_v15 = vmul.f32 0.17677669, %v1611_v14  ;;  %v1697_v16 = vsel %vm1687_vm2, %v1682_v11, -inf }
 0x268   : > { %1698 = vmax.xlane.f32.xlu0 %v1697_v16  ;;  %v2624_v17 = vpop.f32.mrf.mxu1 }
 0x269   : > { %v1683_v12 = vadd.f32 %v1677_v46, %v1669_v15 }
 0x26a   : > { %v1614_v13 = vpop.f32.mrf.mxu1 }
 0x26b   : > { %v1670_v18 = vmul.f32 0.17677669, %v1614_v13  ;;  %v1700_v19 = vsel %vm1687_vm2, %v1683_v12, -inf }
 0x26c   : > { %1701 = vmax.xlane.f32.xlu1 %v1700_v19  ;;  %v2625_v36 = vpop.f32.mrf.mxu1 }
 0x26d   : > { %v3125_v37 = vadd.f32 %v1677_v46, %v1670_v18 }
 0x26e   : > { %v1658_v44 = vpop.f32.mrf.mxu1 }
 0x26f   : > { %v1671_v45 = vmul.f32 0.17677669, %v1658_v44  ;;  %v1703_v20 = vsel %vm1687_vm2, %v3125_v37, -inf }
 0x270   : > { %1704 = vmax.xlane.f32.xlu0 %v1703_v20  ;;  %v2630_v22 = vpop.f32.mrf.mxu1 }
 0x271   : > { %v1685_v24 = vadd.f32 %v1677_v46, %v1671_v45 }
 0x272   : > { %v1661_v26 = vpop.f32.mrf.mxu1 }
 0x273   : > { %v1672_v28 = vmul.f32 0.17677669, %v1661_v26  ;;  %v1706_v29 = vsel %vm1687_vm2, %v1685_v24, -inf }
 0x274   : > { %1707 = vmax.xlane.f32.xlu1 %v1706_v29  ;;  %v2631_v30 = vpop.f32.mrf.mxu1 }
 0x275   : > { %v1686_v31 = vadd.f32 %v1677_v46, %v1672_v28 }
 0x277   : > { %v1709_v32 = vsel %vm1687_vm2, %v1686_v31, -inf }
 0x278   : > { %1710 = vmax.xlane.f32.xlu0 %v1709_v32 }
 0x285   : > { %1182 = vrot.lane.b32.xlu1 %v3133_v39, %s2795_s16 }
 0x289   : > { %1188 = vrot.lane.b32.xlu1 %v3133_v39, %s2796_s17 }
 0x28d   : > { %1190 = vrot.lane.b32.xlu1 %v3139_v40, %s2796_s17 }
 0x28e   : > { %1184 = vrot.lane.b32.xlu0 %v3139_v40, %s2795_s16 }
 0x292   : > { %1194 = vrot.lane.b32.xlu0 %v3133_v39, %s2797_s21 }
 0x2e5   : > { %v1690_v23 = vpop.xlane.xlu0 %1689 }
 0x2e6   : > { %v1712_v27 = vsub.f32 %v1679_v63, %v1690_v23 }
 0x2e8   : > { %v1720_v41 = vmul.f32 1.442695, %v1712_v27 }
 0x2e9   : > { %v1693_v42 = vpop.xlane.xlu1 %1692 }
 0x2ea   : > { %2747 = vpow2.f32 %v1720_v41  ;;  %v1713_v43 = vsub.f32 %v1680_v3, %v1693_v42 }
 0x2ec   : > { %v1722_v33 = vmul.f32 1.442695, %v1713_v43 }
 0x2ed   : > { %v1696_v47 = vpop.xlane.xlu0 %1695 }
 0x2ee   : > { %2749 = vpow2.f32 %v1722_v33  ;;  %v1714_v48 = vsub.f32 %v1681_v7, %v1696_v47 }
 0x2f0   : > { %v1724_v49 = vmul.f32 1.442695, %v1714_v48 }
 0x2f1   : > { %v1699_v50 = vpop.xlane.xlu0 %1698 }
 0x2f2   : > { %2751 = vpow2.f32 %v1724_v49  ;;  %v1715_v51 = vsub.f32 %v1682_v11, %v1699_v50 }
 0x2f4   : > { %v1726_v52 = vmul.f32 1.442695, %v1715_v51 }
 0x2f5   : > { %v1702_v55 = vpop.xlane.xlu1 %1701 }
 0x2f6   : > { %2753 = vpow2.f32 %v1726_v52  ;;  %v1716_v56 = vsub.f32 %v1683_v12, %v1702_v55 }
 0x2f7   : > { %v3147_v57 = vpop.eup %2747 }
 0x2f8   : > { %v1728_v58 = vmul.f32 1.442695, %v1716_v56  ;;  %v1736_v46 = vsel %vm1687_vm2, %v3147_v57, 0.0 }
 0x2f9   : > { %1737 = vadd.xlane.f32.xlu1 %v1736_v46  ;;  %v1705_v62 = vpop.xlane.xlu0 %1704 }
 0x2fa   : > { %2755 = vpow2.f32 %v1728_v58  ;;  %v1717_v14 = vsub.f32 %v3125_v37, %v1705_v62 }
 0x2fb   : > { %v3151_v59 = vpop.eup %2749 }
 0x2fc   : > { %v1739_v61 = vsel %vm1687_vm2, %v3151_v59, 0.0  ;;  %v1730_v15 = vmul.f32 1.442695, %v1717_v14 }
 0x2fd   : > { %v1708_v63 = vpop.xlane.xlu1 %1707  ;;  %1740 = vadd.xlane.f32.xlu0 %v1739_v61 }
 0x2fe   : > { %v1718_v0 = vsub.f32 %v1685_v24, %v1708_v63 }
 0x2ff   : > { %v3155_v1 = vpop.eup %2751 }
 0x300   : > { %v1732_v38 = vmul.f32 1.442695, %v1718_v0  ;;  %v1742_v2 = vsel %vm1687_vm2, %v3155_v1, 0.0 }
 0x301   : > { %1743 = vadd.xlane.f32.xlu1 %v1742_v2  ;;  %v1711_v3 = vpop.xlane.xlu0 %1710  ;;  %v1183_v13 = vpop.permute.xlu1 %1182 }
 0x302   : > { %2757 = vpow2.f32 %v1732_v38  ;;  %v1719_v4 = vsub.f32 %v1686_v31, %v1711_v3 }
 0x303   : > { %v3159_v53 = vpop.eup %2753 }
 0x304   : > { %v1734_v5 = vmul.f32 1.442695, %v1719_v4  ;;  %v1745_v6 = vsel %vm1687_vm2, %v3159_v53, 0.0 }
 0x305   : > { %1746 = vadd.xlane.f32.xlu0 %v1745_v6  ;;  %v1185_v12 = vpop.permute.xlu0 %1184  ;;  %v1189_v19 = vpop.permute.xlu1 %1188 }
 0x306   : > { %2759 = vpow2.f32 %v1734_v5  ;;  %v1200_v45 = vcombine.low %v3133_v39, %v1189_v19  ;;  %v1201_v20 = vcombine.high %v3133_v39, %v1189_v19 }
 0x307   : > { %v3163_v7 = vpop.eup %2755  ;;  %2761 = vpow2.f32 %v1730_v15 }
 0x308   : > { %v1748_v25 = vsel %vm1687_vm2, %v3163_v7, 0.0  ;;  %v1208_v26 = vrot.slane %v1200_v45, %v2999_v54  ;;  %v1215_v28 = vrot.slane %v1201_v20, %v2999_v54 }
 0x309   : > { %1749 = vadd.xlane.f32.xlu0 %v1748_v25  ;;  %v1195_v18 = vpop.permute.xlu0 %1194  ;;  %v1191_v22 = vpop.permute.xlu1 %1190 }
 0x30a   : > { %v1216_v36 = vcombine.low %v1183_v13, %v1195_v18  ;;  %v1217_v44 = vcombine.high %v1183_v13, %v1195_v18  ;;  %v1268_v43 = vcombine.low %v3139_v40, %v1191_v22  ;;  %v1269_v33 = vcombine.high %v3139_v40, %v1191_v22 }
 0x30c   : > { %v1224_v37 = vrot.slane %v1216_v36, %v2999_v54  ;;  %v1231_v24 = vrot.slane %v1217_v44, %v2999_v54  ;;  %v1276_v58 = vrot.slane %v1268_v43, %v2999_v54  ;;  %v1283_v46 = vrot.slane %v1269_v33, %v2999_v54 }
 0x30e   : > { %v1232_v29 = vcombine.low %v1208_v26, %v1224_v37  ;;  %v1233_v30 = vcombine.high %v1208_v26, %v1224_v37  ;;  %v1248_v31 = vcombine.low %v1215_v28, %v1231_v24  ;;  %v1249_v32 = vcombine.high %v1215_v28, %v1231_v24 }
 0x30f   : > { %v3167_v8 = vpop.eup %2757 }
 0x310   : > { %v1754_v9 = vsel %vm1687_vm2, %v3167_v8, 0.0  ;;  %v1240_v35 = vrot.slane %v1232_v29, %v3002_v60  ;;  %v1247_v23 = vrot.slane %v1233_v30, %v3002_v60  ;;  %v1256_v39 = vrot.slane %v1248_v31, %v3002_v60 }
 0x311   : > { %1755 = vadd.xlane.f32.xlu0 %v1754_v9  ;;  %v1263_v27 = vrot.slane %v1249_v32, %v3002_v60 }
 0x312   : > { %1196 = vrot.lane.b32.xlu1 %v3139_v40, %s2797_s21  ;;  %v1336_v47 = vcombine.low %v1240_v35, %v1247_v23  ;;  %v2523_v48 = vcombine.high %v1240_v35, %v1247_v23 }
 0x313   : > { %v3171_v10 = vpop.eup %2759  ;;  %v1352_v49 = vcombine.low %v1256_v39, %v1263_v27  ;;  %v2524_v50 = vcombine.high %v1256_v39, %v1263_v27 }
 0x314   : > { %v1757_v11 = vsel %vm1687_vm2, %v3171_v10, 0.0  ;;  %v3178_v16 = vpop.eup %2761  ;;  %v1343_v61 = vrot.slane %v1336_v47, %v2999_v54  ;;  %v1351_v63 = vrot.slane %v2523_v48, %v2999_v54 }
 0x315   : > { %1758 = vadd.xlane.f32.xlu0 %v1757_v11  ;;  %v1751_v17 = vsel %vm1687_vm2, %v3178_v16, 0.0  ;;  %v1359_v0 = vrot.slane %v1352_v49, %v2999_v54  ;;  %v1367_v38 = vrot.slane %v2524_v50, %v2999_v54 }
 0x316   : > { %v1368_v14 = vcombine.low %v1343_v61, %v1351_v63  ;;  %v1369_v24 = vcombine.high %v1343_v61, %v1351_v63 }
 0x317   : > { %v1384_v15 = vcombine.low %v1359_v0, %v1367_v38  ;;  %v1385_v26 = vcombine.high %v1359_v0, %v1367_v38 }
 0x318   : > { %v1376_v37 = vrot.slane %v1368_v14, %v3002_v60 }
 0x319   : > { %v1392_v22 = vrot.slane %v1384_v15, %v3002_v60  ;;  %v1399_v43 = vrot.slane %v1385_v26, %v3002_v60 }
 0x31b   : > { %v1400_v49 = vcombine.low %v1376_v37, %v1392_v22 }
 0x336   : > { %1752 = vadd.xlane.f32.xlu1 %v1751_v17 }
 0x382   : > { %v1738_v34 = vpop.xlane.xlu1 %1737 }
 0x386   : > { %v1741_v41 = vpop.xlane.xlu0 %1740 }
 0x387   : > { %2763 = vrcp.f32 %v1741_v41 }
 0x38a   : > { %v1744_v42 = vpop.xlane.xlu1 %1743 }
 0x38e   : > { %v1197_v51 = vpop.permute.xlu1 %1196  ;;  %v1747_v52 = vpop.xlane.xlu0 %1746 }
 0x38f   : > { %v1284_v55 = vcombine.low %v1185_v12, %v1197_v51  ;;  %v1285_v56 = vcombine.high %v1185_v12, %v1197_v51  ;;  %2765 = vrcp.f32 %v1747_v52  ;;  %v1401_v51 = vcombine.high %v1376_v37, %v1392_v22 }
 0x390   : > { %2767 = vrcp.f32 %v1738_v34 }
 0x391   : > { %v1292_v62 = vrot.slane %v1284_v55, %v2999_v54  ;;  %v1299_v40 = vrot.slane %v1285_v56, %v2999_v54  ;;  %2769 = vrcp.f32 %v1744_v42  ;;  %v1383_v42 = vrot.slane %v1369_v24, %v3002_v60 }
 0x392   : > { %v1750_v19 = vpop.xlane.xlu0 %1749 }
 0x393   : > { %v1300_v2 = vcombine.low %v1276_v58, %v1292_v62  ;;  %v1301_v3 = vcombine.high %v1276_v58, %v1292_v62  ;;  %v1316_v4 = vcombine.low %v1283_v46, %v1299_v40  ;;  %v1317_v5 = vcombine.high %v1283_v46, %v1299_v40 }
 0x394   : > { %v2764_v34 = vpop.eup %2763  ;;  %v1402_v0 = vcombine.low %v1383_v42, %v1399_v43  ;;  %v1403_v38 = vcombine.high %v1383_v42, %v1399_v43 }
 0x395   : > { %v1308_v6 = vrot.slane %v1300_v2, %v3002_v60  ;;  %v1315_v25 = vrot.slane %v1301_v3, %v3002_v60  ;;  %v1324_v9 = vrot.slane %v1316_v4, %v3002_v60  ;;  %v1331_v11 = vrot.slane %v1317_v5, %v3002_v60 }
 0x396   : > { %v1769_v55 = vmul.f32 %v2764_v34, %v3151_v59 }
 0x397   : > { %v1404_v17 = vcombine.low %v1308_v6, %v1315_v25  ;;  %v2525_v12 = vcombine.high %v1308_v6, %v1315_v25  ;;  %v1420_v13 = vcombine.low %v1324_v9, %v1331_v11  ;;  %v2526_v18 = vcombine.high %v1324_v9, %v1331_v11 }
 0x399   : > { %v1411_v36 = vrot.slane %v1404_v17, %v2999_v54  ;;  %v1419_v44 = vrot.slane %v2525_v12, %v2999_v54  ;;  %v1427_v45 = vrot.slane %v1420_v13, %v2999_v54  ;;  %v1435_v20 = vrot.slane %v2526_v18, %v2999_v54  ;;  %v2743_v12 = vld [vmem:[%s3330_s4 + $0x18] sm:$0xff]   ;;  %v2744_v13 = vld [vmem:[%s3330_s4 + $0x10] sm:$0xff]  }
 0x39a   : > { %v1756_v28 = vpop.xlane.xlu0 %1755 }
 0x39b   : > { %v1436_v29 = vcombine.low %v1411_v36, %v1419_v44  ;;  %v1452_v30 = vcombine.low %v1427_v45, %v1435_v20  ;;  %v1437_v31 = vcombine.high %v1411_v36, %v1419_v44  ;;  %v1453_v32 = vcombine.high %v1427_v45, %v1435_v20 }
 0x39c   : > { %v2766_v35 = vpop.eup %2765  ;;  %2771 = vrcp.f32 %v1756_v28 }
 0x39d   : > { %v1444_v23 = vrot.slane %v1436_v29, %v3002_v60  ;;  %v1460_v39 = vrot.slane %v1452_v30, %v3002_v60  ;;  %v1451_v27 = vrot.slane %v1437_v31, %v3002_v60  ;;  %v2768_v41 = vpop.eup %2767  ;;  %v1467_v33 = vrot.slane %v1453_v32, %v3002_v60 }
 0x39e   : > { %v2770_v47 = vpop.eup %2769  ;;  %v1759_v48 = vpop.xlane.xlu0 %1758  ;;  %v1771_v56 = vmul.f32 %v2766_v35, %v3159_v53  ;;  %v1768_v40 = vmul.f32 %v2768_v41, %v3147_v57 }
 0x39f   : > { %v1468_v50 = vcombine.low %v1444_v23, %v1460_v39  ;;  %v1469_v52 = vcombine.high %v1444_v23, %v1460_v39  ;;  %2773 = vrcp.f32 %v1759_v48  ;;  %v1470_v61 = vcombine.low %v1451_v27, %v1467_v33 }
 0x3a0   : > { %v1471_v62 = vcombine.high %v1451_v27, %v1467_v33  ;;  %v1770_v63 = vmul.f32 %v2770_v47, %v3155_v1  ;;  %v1776_v2 = vpack.c.bf16 %v1769_v55, %v1768_v40  ;;  %2775 = vrcp.f32 %v1750_v19 }
 0x3a1   : > { %v1472_v58 = vpack.c.bf16 %v1468_v50, %v1400_v49  ;;  %v1473_v46 = vpack.c.bf16 %v1469_v52, %v1401_v51  ;;  %v1474_v59 = vpack.c.bf16 %v1470_v61, %v1402_v0 }
 0x3a2   : > { %v1777_v3 = vpack.c.bf16 %v1771_v56, %v1770_v63  ;;  %v1475_v53 = vpack.c.bf16 %v1471_v62, %v1403_v38 }
 0x3a3   : > { %2633 = vmatpush3.bf16.msra.mxu0 %v1472_v58  ;;  %2639 = vmatpush3.bf16.msra.mxu1 %v1473_v46 }
 0x3a4   : > { %2644 = vmatprep.subr.bf16.mxu0 %v2794_v21  ;;  %2650 = vmatprep.subr.bf16.mxu1 %v2794_v21 }
 0x3a6   : > { %2635 = vmatmul.mubr.msk.bf16.vlgmr.msra.gmra.mxu0 %vm1687_vm2, %v1776_v2  ;;  %2641 = vmatmul.mubr.msk.bf16.vlgmr.msra.gmra.mxu1 %vm1687_vm2, %v1777_v3 }
 0x3a7   : > { %2645 = vmatpush3.bf16.msra.mxu0 %v1474_v59  ;;  %2651 = vmatpush3.bf16.msra.mxu1 %v1475_v53 }
 0x3a8   : > { %2652 = vmatprep.mubr.msk.bf16.mxu1 %vm2798_vm0, %v2794_v21  ;;  %2646 = vmatprep.mubr.msk.bf16.mxu0 %vm2798_vm0, %v2794_v21 }
 0x3a9   : > { %2656 = vmatprep.subr.bf16.mxu0 %v2794_v21  ;;  %v2772_v57 = vpop.eup %2771 }
 0x3aa   : > { %v1774_v4 = vmul.f32 %v2772_v57, %v3167_v8  ;;  %v2739_v8 = vld [vmem:[%s3330_s4 + $0x38] sm:$0xff]  }
 0x3ac   : > { %v2774_v1 = vpop.eup %2773 }
 0x3ad   : > { %v1775_v5 = vmul.f32 %v2774_v1, %v3171_v10  ;;  %v2776_v9 = vpop.eup %2775  ;;  %v2740_v10 = vld [vmem:[%s3330_s4 + $0x30] sm:$0xff]  }
 0x3ae   : > { %v1772_v14 = vmul.f32 %v2776_v9, %v3163_v7  ;;  %v2741_v7 = vld [vmem:[%s3330_s4 + $0x28] sm:$0xff]  }
 0x3af   : > { %v1779_v6 = vpack.c.bf16 %v1775_v5, %v1774_v4 }
 0x3b1   : > { %2653 = vmatmul.mubr.msk.bf16.vlgmr.msra.gmra.mxu1 %vm1687_vm2, %v1779_v6 }
 0x3bf   : > { %v1753_v25 = vpop.xlane.xlu1 %1752 }
 0x3c0   : > { %2777 = vrcp.f32 %v1753_v25 }
 0x3cd   : > { %v2778_v11 = vpop.eup %2777 }
 0x3ce   : > { %v1773_v15 = vmul.f32 %v2778_v11, %v3178_v16  ;;  %v2742_v16 = vld [vmem:[%s3330_s4 + $0x20] sm:$0xff]  }
 0x3d0   : > { %v1778_v17 = vpack.c.bf16 %v1773_v15, %v1772_v14 }
 0x3d2   : > { %2647 = vmatmul.mubr.msk.bf16.vlgmr.msra.gmra.mxu0 %vm1687_vm2, %v1778_v17 }
 0x3d3   : > { %2672 = vmatprep.mubr.msk.bf16.mxu0 %vm2798_vm0, %v2794_v21  ;;  %2657 = vmatpush3.bf16.msra.mxu0 %v2739_v8 }
 0x3d4   : > { %2658 = vmatprep.subr.bf16.mxu0 %v2794_v21 }
 0x3d7   : > { %2659 = vmatpush3.bf16.msra.mxu0 %v2740_v10 }
 0x3d8   : > { %2660 = vmatprep.subr.bf16.mxu0 %v2794_v21 }
 0x3db   : > { %2661 = vmatpush3.bf16.msra.mxu0 %v2741_v7 }
 0x3dc   : > { %2662 = vmatprep.subr.bf16.mxu0 %v2794_v21 }
 0x3df   : > { %2663 = vmatpush3.bf16.msra.mxu0 %v2742_v16 }
 0x3e0   : > { %2664 = vmatprep.subr.bf16.mxu0 %v2794_v21 }
 0x3e3   : > { %2665 = vmatpush3.bf16.msra.mxu0 %v2743_v12 }
 0x3e4   : > { %2666 = vmatprep.subr.bf16.mxu0 %v2794_v21 }
 0x3e7   : > { %2667 = vmatpush3.bf16.msra.mxu0 %v2744_v13 }
 0x3e8   : > { %2668 = vmatprep.subr.bf16.mxu0 %v2794_v21 }
 0x466   : > { %v1817_v18 = vpop.f32.mrf.mxu0  ;;  %v1861_v19 = vpop.f32.mrf.mxu1 }
 0x468   : > { %v2636_v36 = vpop.f32.mrf.mxu0  ;;  %v2642_v44 = vpop.f32.mrf.mxu1 }
 0x46a   : > { %v1820_v45 = vpop.f32.mrf.mxu0  ;;  %v1864_v20 = vpop.f32.mrf.mxu1 }
 0x46c   : > { %v2637_v37 = vpop.f32.mrf.mxu0  ;;  %v2643_v22 = vpop.f32.mrf.mxu1 }
 0x471   : > { %v1949_v24 = vpop.f32.mrf.mxu1 }
 0x472   : > { %v1972_v30 = vcombine.low %v1861_v19, %v1949_v24  ;;  %v1973_v31 = vcombine.high %v1861_v19, %v1949_v24 }
 0x473   : > { %v2654_v26 = vpop.f32.mrf.mxu1 }
 0x474   : > { %v1980_v39 = vrot.slane %v1972_v30, %v2999_v54  ;;  %v1987_v27 = vrot.slane %v1973_v31, %v2999_v54 }
 0x475   : > { %v1952_v28 = vpop.f32.mrf.mxu1 }
 0x476   : > { %v2040_v43 = vcombine.low %v1864_v20, %v1952_v28  ;;  %v2041_v33 = vcombine.high %v1864_v20, %v1952_v28  ;;  %v2745_v20 = vld [vmem:[%s3330_s4 + $0x8] sm:$0xff]  }
 0x477   : > { %v2655_v29 = vpop.f32.mrf.mxu1  ;;  %2669 = vmatpush3.bf16.msra.mxu0 %v2745_v20 }
 0x478   : > { %v2048_v40 = vrot.slane %v2040_v43, %v2999_v54  ;;  %v2055_v63 = vrot.slane %v2041_v33, %v2999_v54  ;;  %2670 = vmatprep.subr.bf16.mxu0 %v2794_v21 }
 0x492   : > { %v1905_v32 = vpop.f32.mrf.mxu0 }
 0x493   : > { %v1956_v34 = vcombine.low %v1817_v18, %v1905_v32  ;;  %v1957_v35 = vcombine.high %v1817_v18, %v1905_v32 }
 0x494   : > { %v2648_v23 = vpop.f32.mrf.mxu0 }
 0x495   : > { %v1964_v41 = vrot.slane %v1956_v34, %v2999_v54  ;;  %v1971_v42 = vrot.slane %v1957_v35, %v2999_v54 }
 0x496   : > { %v1908_v47 = vpop.f32.mrf.mxu0 }
 0x497   : > { %v1988_v48 = vcombine.low %v1964_v41, %v1980_v39  ;;  %v1989_v49 = vcombine.high %v1964_v41, %v1980_v39  ;;  %v2004_v50 = vcombine.low %v1971_v42, %v1987_v27  ;;  %v2005_v51 = vcombine.high %v1971_v42, %v1987_v27  ;;  %v2746_v41 = vld [vmem:[%s3330_s4] sm:$0xff]  }
 0x498   : > { %v2024_v52 = vcombine.low %v1820_v45, %v1908_v47  ;;  %v2025_v55 = vcombine.high %v1820_v45, %v1908_v47  ;;  %v2649_v56 = vpop.f32.mrf.mxu0  ;;  %2671 = vmatpush3.bf16.msra.mxu0 %v2746_v41 }
 0x499   : > { %v1996_v58 = vrot.slane %v1988_v48, %v3002_v60  ;;  %v2003_v46 = vrot.slane %v1989_v49, %v3002_v60  ;;  %v2012_v61 = vrot.slane %v2004_v50, %v3002_v60  ;;  %v2019_v62 = vrot.slane %v2005_v51, %v3002_v60 }
 0x49a   : > { %v2032_v0 = vrot.slane %v2024_v52, %v2999_v54  ;;  %v2039_v38 = vrot.slane %v2025_v55, %v2999_v54 }
 0x49b   : > { %v2092_v2 = vcombine.low %v1996_v58, %v2003_v46  ;;  %v2535_v3 = vcombine.high %v1996_v58, %v2003_v46  ;;  %v2108_v59 = vcombine.low %v2012_v61, %v2019_v62  ;;  %v2536_v53 = vcombine.high %v2012_v61, %v2019_v62 }
 0x49c   : > { %v2056_v57 = vcombine.low %v2032_v0, %v2048_v40  ;;  %v2057_v1 = vcombine.high %v2032_v0, %v2048_v40  ;;  %v2072_v4 = vcombine.low %v2039_v38, %v2055_v63  ;;  %v2073_v5 = vcombine.high %v2039_v38, %v2055_v63 }
 0x49d   : > { %v2099_v6 = vrot.slane %v2092_v2, %v2999_v54  ;;  %v2107_v25 = vrot.slane %v2535_v3, %v2999_v54  ;;  %v2115_v9 = vrot.slane %v2108_v59, %v2999_v54  ;;  %v2123_v11 = vrot.slane %v2536_v53, %v2999_v54 }
 0x49e   : > { %v2064_v14 = vrot.slane %v2056_v57, %v3002_v60  ;;  %v2071_v15 = vrot.slane %v2057_v1, %v3002_v60  ;;  %v2080_v17 = vrot.slane %v2072_v4, %v3002_v60  ;;  %v2087_v8 = vrot.slane %v2073_v5, %v3002_v60  ;;  %v2539_v1 = vld [vmem:[%s3331_s5] ss:$0 sm:$0xff] }
 0x49f   : > { %v2125_v10 = vcombine.high %v2099_v6, %v2107_v25  ;;  %v2141_v7 = vcombine.high %v2115_v9, %v2123_v11  ;;  %v2124_v16 = vcombine.low %v2099_v6, %v2107_v25  ;;  %v2140_v12 = vcombine.low %v2115_v9, %v2123_v11  ;;  %v2783_v25 = vld [vmem:[%s2907_s20] sm:$0xff] }
 0x4a0   : > { %v2160_v13 = vcombine.low %v2064_v14, %v2071_v15  ;;  %v2537_v18 = vcombine.high %v2064_v14, %v2071_v15  ;;  %v2176_v19 = vcombine.low %v2080_v17, %v2087_v8  ;;  %v2538_v36 = vcombine.high %v2080_v17, %v2087_v8  ;;  %v2784_v17 = vld [vmem:[%s2907_s20 + $0x8] sm:$0xff] }
 0x4a1   : > { %v2132_v44 = vrot.slane %v2124_v16, %v3002_v60  ;;  %v2148_v45 = vrot.slane %v2140_v12, %v3002_v60  ;;  %v2139_v28 = vrot.slane %v2125_v10, %v3002_v60  ;;  %v2155_v29 = vrot.slane %v2141_v7, %v3002_v60 }
 0x4a2   : > { %v2167_v37 = vrot.slane %v2160_v13, %v2999_v54  ;;  %v2175_v22 = vrot.slane %v2537_v18, %v2999_v54  ;;  %v2183_v24 = vrot.slane %v2176_v19, %v2999_v54  ;;  %v2191_v26 = vrot.slane %v2538_v36, %v2999_v54 }
 0x4a3   : > { %v2156_v30 = vcombine.low %v2132_v44, %v2148_v45  ;;  %v2158_v42 = vcombine.low %v2139_v28, %v2155_v29  ;;  %v2157_v33 = vcombine.high %v2132_v44, %v2148_v45  ;;  %v2159_v51 = vcombine.high %v2139_v28, %v2155_v29  ;;  %v2548_v28 = vld [vmem:[%s3332_s6] ss:$0 sm:$0xff] }
 0x4a4   : > { %v2193_v31 = vcombine.high %v2167_v37, %v2175_v22  ;;  %v2209_v32 = vcombine.high %v2183_v24, %v2191_v26  ;;  %v2192_v34 = vcombine.low %v2167_v37, %v2175_v22  ;;  %v2208_v35 = vcombine.low %v2183_v24, %v2191_v26 }
 0x4a6   : > { %v2207_v23 = vrot.slane %v2193_v31, %v3002_v60  ;;  %v2223_v39 = vrot.slane %v2209_v32, %v3002_v60  ;;  %v2200_v27 = vrot.slane %v2192_v34, %v3002_v60  ;;  %v2216_v54 = vrot.slane %v2208_v35, %v3002_v60 }
 0x4a8   : > { %v2226_v43 = vcombine.low %v2207_v23, %v2223_v39  ;;  %v2225_v47 = vcombine.high %v2200_v27, %v2216_v54  ;;  %v2224_v48 = vcombine.low %v2200_v27, %v2216_v54  ;;  %v2227_v50 = vcombine.high %v2207_v23, %v2223_v39 }
 0x4aa   : > { %v2697_v49 = vpack.i.bf16 %v2226_v43, %v2158_v42  ;;  %v2692_v21 = vpack.i.bf16 %v2225_v47, %v2157_v33  ;;  %v2702_v52 = vpack.i.bf16 %v2227_v50, %v2159_v51 }
 0x4ac   : > { %2698 = vrot.lane.b32.xlu0 %v2697_v49, %s2796_s17  ;;  %2693 = vrot.lane.b32.xlu1 %v2692_v21, %s2797_s21 }
 0x4b0   : > { %2703 = vrot.lane.b32.xlu1 %v2702_v52, %s2795_s16 }
 0x51e   : > { %v2699_v60 = vpop.permute.xlu0 %2698  ;;  %v2694_v55 = vpop.permute.xlu1 %2693 }
 0x51f   : > { %v2696_v56 = vunpack.i.h.bf16 %v2694_v55  ;;  %v2695_v58 = vunpack.i.l.bf16 %v2694_v55  ;;  %v2701_v46 = vunpack.i.h.bf16 %v2699_v60  ;;  %v2700_v61 = vunpack.i.l.bf16 %v2699_v60 }
 0x521   : > { %v2252_v62 = vsel %vm1476_vm1, %v2156_v30, %v2695_v58  ;;  %v2253_v40 = vsel %vm1476_vm1, %v2224_v48, %v2696_v56  ;;  %v2549_v30 = vld [vmem:[%s3333_s7] ss:$0 sm:$0xff] }
 0x522   : > { %v2704_v63 = vpop.permute.xlu1 %2703  ;;  %v2255_v2 = vsel %vm2254_vm3, %v2252_v62, %v2700_v61  ;;  %v2256_v3 = vsel %vm2254_vm3, %v2253_v40, %v2701_v46 }
 0x523   : > { %v2706_v0 = vunpack.i.h.bf16 %v2704_v63  ;;  %v2705_v38 = vunpack.i.l.bf16 %v2704_v63 }
 0x525   : > { %v2258_v59 = vsel %vm2257_vm4, %v2255_v2, %v2705_v38  ;;  %v2259_v53 = vsel %vm2257_vm4, %v2256_v3, %v2706_v0 }
 0x526   : > { %v2276_v57 = vpack.c.bf16 %v2259_v53, %v2258_v59 }
 0x528   : > { %2673 = vmatmul.mubr.bf16.vlgmr.msra.gmra.mxu0 %v2276_v57 }
 0x5e8   : > { %v2366_v4 = vpop.f32.mrf.mxu0 }
 0x5e9   : > { %v2367_v5 = vadd.f32 %v2539_v1, %v2366_v4 }
 0x5ea   : > { %v2674_v6 = vpop.f32.mrf.mxu0 }
 0x5eb   : > { %v2373_v9 = vadd.f32 %v2783_v25, %v2367_v5 }
 0x5ec   : > { %v2369_v11 = vpop.f32.mrf.mxu0 }
 0x5ed   : > { %v2370_v14 = vadd.f32 %v2539_v1, %v2369_v11  ;;  %2377 = vadd.xlane.f32.xlu1 %v2373_v9 }
 0x5ee   : > { %v2675_v15 = vpop.f32.mrf.mxu0 }
 0x5ef   : > { %v2374_v8 = vadd.f32 %v2784_v17, %v2370_v14 }
 0x5f1   : > { %2379 = vadd.xlane.f32.xlu0 %v2374_v8 }
 0x676   : > { %v2378_v10 = vpop.xlane.xlu1 %2377 }
 0x677   : > { %v2382_v7 = vmul.f32 0.0078125, %v2378_v10 }
 0x679   : > { %v2384_v16 = vsub.f32 %v2373_v9, %v2382_v7 }
 0x67a   : > { %v2380_v12 = vpop.xlane.xlu0 %2379 }
 0x67b   : > { %v2383_v13 = vmul.f32 0.0078125, %v2380_v12  ;;  %v2386_v18 = vmul.f32 %v2384_v16, %v2384_v16 }
 0x67d   : > { %v2385_v19 = vsub.f32 %v2374_v8, %v2383_v13  ;;  %2388 = vadd.xlane.f32.xlu0 %v2386_v18 }
 0x67f   : > { %v2387_v36 = vmul.f32 %v2385_v19, %v2385_v19 }
 0x681   : > { %2390 = vadd.xlane.f32.xlu1 %v2387_v36 }
 0x706   : > { %v2389_v44 = vpop.xlane.xlu0 %2388 }
 0x707   : > { %v2392_v45 = vmul.f32 0.0078125, %v2389_v44 }
 0x709   : > { %v2394_v20 = vadd.f32 1e-12, %v2392_v45 }
 0x70a   : > { %v2391_v37 = vpop.xlane.xlu1 %2390 }
 0x70b   : > { %2779 = vrsqrt.f32 %v2394_v20  ;;  %v2393_v22 = vmul.f32 0.0078125, %v2391_v37 }
 0x70d   : > { %v2395_v24 = vadd.f32 1e-12, %v2393_v22 }
 0x70f   : > { %2781 = vrsqrt.f32 %v2395_v24 }
 0x718   : > { %v2780_v26 = vpop.eup %2779 }
 0x719   : > { %v2398_v29 = vmul.f32 %v2780_v26, %v2384_v16 }
 0x71b   : > { %v2406_v31 = vmul.f32 %v2548_v28, %v2398_v29 }
 0x71c   : > { %v2782_v32 = vpop.eup %2781 }
 0x71d   : > { %v2414_v34 = vadd.f32 %v2549_v30, %v2406_v31  ;;  %v2399_v35 = vmul.f32 %v2782_v32, %v2385_v19 }
 0x71f   : > { %2416 = vst [vmem:[%s319_s15] sm:$0xff] %v2414_v34  ;;  %v2407_v23 = vmul.f32 %v2548_v28, %v2399_v35 }
 0x721   : > { %v2415_v39 = vadd.f32 %v2549_v30, %v2407_v23 }
 0x723   : > { %2417 = vst [vmem:[%s319_s15 + $0x8] sm:$0xff] %v2415_v39 }
 0x724 PF: > { %s18_s27 = sadd.s32 1, %s2791_s27  }
 0x725   : > { %p15_p4 = scmp.ge.s32.totalorder %s18_s27, 4  }
 0x727   :  { %17 = sbr.rel (!%p15_p4) target bundleno = 1 (0x1), region = 85 }

// kernel: _lambda_.13
= control target key start
LH: loop header
LB: loop body
LE: loop exit
PB: predicated region body
PF: predicated region fallthrough
CT: control target
= control target key end

     0   :  { %v83_v34 = vlaneseq  ;;  %s619_s1 = inlined_call_operand.vmem [shape: bf16[512,128], index: 1, kind: input, shape index: {}]   ;;  %s620_s0 = inlined_call_operand.vmem [shape: f32[8,128], index: 0, kind: input, shape index: {}]   ;;  %s621_s2 = inlined_call_operand.vmem [shape: f32[1,512], index: 2, kind: input, shape index: {}]   ;;  %s622_s3 = inlined_call_operand.vmem [shape: f32[8,512], index: 3, kind: output, shape index: {}]  }
   0x1   :  { %v453_v0 = vld [vmem:[%s619_s1 + $0x78] sm:$0xff]   ;;  %v457_v4 = vld [vmem:[%s619_s1 + $0x70] sm:$0xff]   ;;  %v461_v8 = vld [vmem:[%s619_s1 + $0x68] sm:$0xff]  }
   0x2   :  { %v454_v1 = vld [vmem:[%s619_s1 + $0xf8] sm:$0xff]   ;;  %417 = vmatprep.subr.bf16.mxu0 %v453_v0  ;;  %v458_v5 = vld [vmem:[%s619_s1 + $0xf0] sm:$0xff]   ;;  %v462_v9 = vld [vmem:[%s619_s1 + $0xe8] sm:$0xff]   ;;  %v84_v35 = vshrl.u32 %v83_v34, 7 }
   0x3   :  { %v455_v2 = vld [vmem:[%s619_s1 + $0x38] sm:$0xff]   ;;  %435 = vmatprep.subr.bf16.mxu1 %v454_v1  ;;  %v459_v6 = vld [vmem:[%s619_s1 + $0x30] sm:$0xff]   ;;  %v463_v10 = vld [vmem:[%s619_s1 + $0x28] sm:$0xff]  }
   0x4   :  { %v456_v3 = vld [vmem:[%s619_s1 + $0xb8] sm:$0xff]   ;;  %418 = vmatpush3.bf16.xpose.msra.mxu0 %v455_v2  ;;  %v460_v7 = vld [vmem:[%s619_s1 + $0xb0] sm:$0xff]   ;;  %v464_v11 = vld [vmem:[%s619_s1 + $0xa8] sm:$0xff]   ;;  %v85_v36 = vsub.s32 0, %v84_v35  ;;  %v93_v38 = vsub.s32 2, %v84_v35  ;;  %v89_v39 = vsub.s32 1, %v84_v35 }
   0x5   :  { %436 = vmatpush3.bf16.xpose.msra.mxu1 %v456_v3  ;;  %419 = vmatprep.subr.bf16.mxu0 %v457_v4  ;;  %v465_v12 = vld [vmem:[%s619_s1 + $0x60] sm:$0xff]   ;;  %v469_v16 = vld [vmem:[%s619_s1 + $0x58] sm:$0xff]   ;;  %v473_v21 = vld [vmem:[%s619_s1 + $0x50] sm:$0xff]   ;;  %v97_v40 = vsub.s32 3, %v84_v35 }
   0x6   :  { %437 = vmatprep.subr.bf16.mxu1 %v458_v5  ;;  %v466_v13 = vld [vmem:[%s619_s1 + $0xe0] sm:$0xff]   ;;  %v470_v17 = vld [vmem:[%s619_s1 + $0xd8] sm:$0xff]   ;;  %v474_v23 = vld [vmem:[%s619_s1 + $0xd0] sm:$0xff]  }
   0x7   :  { %v467_v14 = vld [vmem:[%s619_s1 + $0x20] sm:$0xff]   ;;  %v471_v18 = vld [vmem:[%s619_s1 + $0x18] sm:$0xff]   ;;  %v475_v24 = vld [vmem:[%s619_s1 + $0x10] sm:$0xff]  }
   0x8   :  { %v468_v15 = vld [vmem:[%s619_s1 + $0xa0] sm:$0xff]   ;;  %v472_v20 = vld [vmem:[%s619_s1 + $0x98] sm:$0xff]   ;;  %v476_v25 = vld [vmem:[%s619_s1 + $0x90] sm:$0xff]  }
   0x9   :  { %v15_v19 = vld [vmem:[%s620_s0] sm:$0xff]  ;;  %v477_v26 = vld [vmem:[%s619_s1 + $0x48] sm:$0xff]  }
   0xa   :  { %v80_v22 = vpack.c.bf16 %v15_v19, %v15_v19  ;;  %v478_v27 = vld [vmem:[%s619_s1 + $0xc8] sm:$0xff]   ;;  %v481_v30 = vld [vmem:[%s619_s1 + $0x40] sm:$0xff]  }
   0xb   :  { %v479_v28 = vld [vmem:[%s619_s1 + $0x8] sm:$0xff]   ;;  %v482_v31 = vld [vmem:[%s619_s1 + $0xc0] sm:$0xff]  }
   0xc   :  { %420 = vmatpush3.bf16.xpose.msra.mxu0 %v459_v6  ;;  %433 = vmatprep.mubr.bf16.mxu0 %v80_v22  ;;  %v480_v29 = vld [vmem:[%s619_s1 + $0x88] sm:$0xff]   ;;  %v483_v32 = vld [vmem:[%s619_s1] sm:$0xff]  }
   0xd   :  { %438 = vmatpush3.bf16.xpose.msra.mxu1 %v460_v7  ;;  %421 = vmatprep.subr.bf16.mxu0 %v461_v8  ;;  %v484_v33 = vld [vmem:[%s619_s1 + $0x80] sm:$0xff]  }
   0xe   :  { %439 = vmatprep.subr.bf16.mxu1 %v462_v9  ;;  %451 = vmatprep.mubr.bf16.mxu1 %v80_v22  ;;  %v81_v37 = vld [vmem:[%s621_s2] sm:$0xf] }
   0xf   :  { %v86_v41 = vrot.slane %v81_v37, %v85_v36  ;;  %v94_v42 = vrot.slane %v81_v37, %v93_v38  ;;  %v90_v43 = vrot.slane %v81_v37, %v89_v39  ;;  %v98_v45 = vrot.slane %v81_v37, %v97_v40 }
  0x14   :  { %422 = vmatpush3.bf16.xpose.msra.mxu0 %v463_v10 }
  0x15   :  { %440 = vmatpush3.bf16.xpose.msra.mxu1 %v464_v11  ;;  %423 = vmatprep.subr.bf16.mxu0 %v465_v12 }
  0x16   :  { %441 = vmatprep.subr.bf16.mxu1 %v466_v13 }
  0x1c   :  { %424 = vmatpush3.bf16.xpose.msra.mxu0 %v467_v14 }
  0x1d   :  { %442 = vmatpush3.bf16.xpose.msra.mxu1 %v468_v15  ;;  %425 = vmatprep.subr.bf16.mxu0 %v469_v16 }
  0x1e   :  { %443 = vmatprep.subr.bf16.mxu1 %v470_v17 }
  0x24   :  { %426 = vmatpush3.bf16.xpose.msra.mxu0 %v471_v18 }
  0x25   :  { %444 = vmatpush3.bf16.xpose.msra.mxu1 %v472_v20  ;;  %427 = vmatprep.subr.bf16.mxu0 %v473_v21 }
  0x26   :  { %445 = vmatprep.subr.bf16.mxu1 %v474_v23 }
  0x2c   :  { %428 = vmatpush3.bf16.xpose.msra.mxu0 %v475_v24 }
  0x2d   :  { %446 = vmatpush3.bf16.xpose.msra.mxu1 %v476_v25  ;;  %429 = vmatprep.subr.bf16.mxu0 %v477_v26 }
  0x2e   :  { %447 = vmatprep.subr.bf16.mxu1 %v478_v27 }
  0x34   :  { %430 = vmatpush3.bf16.xpose.msra.mxu0 %v479_v28 }
  0x35   :  { %448 = vmatpush3.bf16.xpose.msra.mxu1 %v480_v29  ;;  %431 = vmatprep.subr.bf16.mxu0 %v481_v30 }
  0x36   :  { %449 = vmatprep.subr.bf16.mxu1 %v482_v31 }
  0x3c   :  { %432 = vmatpush3.bf16.xpose.msra.mxu0 %v483_v32 }
  0x3d   :  { %450 = vmatpush3.bf16.xpose.msra.mxu1 %v484_v33 }
  0x43   :  { %434 = vmatmul.mubr.bf16.vlgmr.msra.gmra.mxu0 %v80_v22 }
  0x44   :  { %452 = vmatmul.mubr.bf16.vlgmr.msra.gmra.mxu1 %v80_v22 }
 0x103   :  { %v329_v44 = vpop.f32.mrf.mxu0 }
 0x104   :  { %v330_v46 = vadd.f32 %v329_v44, %v86_v41  ;;  %v370_v47 = vpop.f32.mrf.mxu1 }
 0x105   :  { %v371_v48 = vadd.f32 %v370_v47, %v94_v42  ;;  %v331_v49 = vpop.f32.mrf.mxu0 }
 0x106   :  { %377 = vst [vmem:[%s622_s3] sm:$0xff] %v330_v46  ;;  %v332_v50 = vadd.f32 %v331_v49, %v90_v43  ;;  %v372_v51 = vpop.f32.mrf.mxu1 }
 0x107   :  { %379 = vst [vmem:[%s622_s3 + $0x10] sm:$0xff] %v371_v48  ;;  %v373_v52 = vadd.f32 %v372_v51, %v98_v45  ;;  %v333_v53 = vpop.f32.mrf.mxu0 }
 0x108   :  { %378 = vst [vmem:[%s622_s3 + $0x8] sm:$0xff] %v332_v50  ;;  %v374_v54 = vpop.f32.mrf.mxu1 }
 0x109   :  { %380 = vst [vmem:[%s622_s3 + $0x18] sm:$0xff] %v373_v52  ;;  %v334_v55 = vpop.f32.mrf.mxu0 }
 0x10a   :  { %v375_v56 = vpop.f32.mrf.mxu1 }

</bundles_post_ra>
